<compile_context>
chip_gen: v7x
topology: tpu7x:2x2x1
jax: 0.10.0
libtpu: 0.0.40
codegen_flags: <defaults>
</compile_context>

<pallas_src>
import functools

import jax
import jax.numpy as jnp
from jax.experimental import pallas as pl
from jax.experimental.pallas import tpu as pltpu

NUM_CLASSES = 20

# backbone channel sizes
C_IN = 4
C_STEM = 16
C_EXP = 32
C_SE = 8
C_HEAD = 64
K_RAW = 9 * C_IN        # 36 = 3*3*C_IN stem im2col contraction
K_PAD = 40              # padded to a multiple of 8 (sublane alignment)


def _round_up(n, m):
    return ((n + m - 1) // m) * m


# ----------------------------------------------------------------------------
# Fused Pallas kernel: one grid step == one image, patches -> logits.
# ----------------------------------------------------------------------------
def _fused_effnet_kernel(Ho, Wo,
                         patches_ref,
                         stem_w_ref, stem_b_ref,
                         exp_w_ref, exp_b_ref,
                         dw_w_ref, dw_s_ref, dw_b_ref,
                         se_w1_ref, se_b1_ref,
                         se_w2_ref, se_b2_ref,
                         proj_w_ref, proj_b_ref,
                         head_w_ref, head_b_ref,
                         fc_w_ref, fc_b_ref,
                         out_ref,
                         pad_ref):
    HW = Ho * Wo
    pad_top = _round_up(Wo + 1, 8)   # zero rows above/below the flat map

    def mm(x, w_ref, b_ref):
        # bf16 operands into the MXU, f32 accumulation, f32 elementwise after.
        y = jnp.dot(x.astype(jnp.bfloat16), w_ref[...],
                    preferred_element_type=jnp.float32)
        return y + b_ref[...]

    def silu(v):
        return v * jax.nn.sigmoid(v)

    x = patches_ref[0]                                     # (HW, K_PAD) f32

    # --- stem 3x3 / stride-2 conv (im2col matmul) + folded BN + SiLU ---------
    stem = silu(mm(x, stem_w_ref, stem_b_ref))             # (HW, C_STEM)

    # --- MBConv expand 1x1 + folded BN + SiLU --------------------------------
    expd = silu(mm(stem, exp_w_ref, exp_b_ref))            # (HW, C_EXP)

    # --- depthwise 3x3, SAME padding -----------------------------------------
    # Write the flat (HW, C) map into a zero-padded VMEM scratch so vertical
    # (dy) out-of-range taps read zeros; horizontal (dx) validity is a mask.
    pad_ref[...] = jnp.zeros_like(pad_ref)
    pad_ref[pad_top:pad_top + HW, :] = expd

    col = jax.lax.broadcasted_iota(jnp.int32, (HW, C_EXP), 0) % Wo
    m_left = (col >= 1).astype(jnp.float32)                # dx = -1 valid
    m_right = (col <= Wo - 2).astype(jnp.float32)          # dx = +1 valid

    acc = jnp.zeros((HW, C_EXP), jnp.float32)
    t = 0
    for dy in (-1, 0, 1):
        for dx in (-1, 0, 1):
            s = dy * Wo + dx
            tap = pad_ref[pad_top + s:pad_top + s + HW, :]  # (HW, C_EXP)
            if dx == -1:
                tap = tap * m_left
            elif dx == 1:
                tap = tap * m_right
            acc = acc + tap * dw_w_ref[t:t + 1, :]
            t += 1
    dwo = silu(acc * dw_s_ref[...] + dw_b_ref[...])        # folded BN + SiLU

    # --- Squeeze-and-Excite (per image) --------------------------------------
    pooled = jnp.mean(dwo, axis=0, keepdims=True)          # (1, C_EXP)
    se = silu(mm(pooled, se_w1_ref, se_b1_ref))            # (1, C_SE)
    gate = jax.nn.sigmoid(mm(se, se_w2_ref, se_b2_ref))    # (1, C_EXP)

    # --- project 1x1 + folded BN, SE gate folded into the matmul, residual ---
    proj = mm(dwo * gate, proj_w_ref, proj_b_ref) + stem   # (HW, C_STEM)

    # --- head 1x1 + folded BN + SiLU -----------------------------------------
    head = silu(mm(proj, head_w_ref, head_b_ref))          # (HW, C_HEAD)

    # --- global average pool + classifier ------------------------------------
    feat = jnp.mean(head, axis=0, keepdims=True)           # (1, C_HEAD)
    logits = mm(feat, fc_w_ref, fc_b_ref)                  # (1, NUM_CLASSES)

    out_ref[...] = logits[None].astype(out_ref.dtype)      # (1, 1, NUM_CLASSES)


# ----------------------------------------------------------------------------
# Host-side glue: parameters, BN folding (done once), im2col, forward wrapper.
# ----------------------------------------------------------------------------
def _fold_bn(gamma, beta, mean, var, eps=1e-3):
    scale = gamma / jnp.sqrt(var + eps)
    shift = beta - mean * scale
    return scale, shift


def init_params(key):
    """Deterministic stand-in weights for the injected EfficientNet backbone."""
    ks = jax.random.split(key, 16)

    def nrm(k, shape, s=0.1):
        return jax.random.normal(k, shape, jnp.float32) * s

    def bn(k, c):
        k1, k2, k3 = jax.random.split(k, 3)
        return (1.0 + nrm(k1, (c,), 0.05), nrm(k2, (c,), 0.05),
                nrm(k3, (c,), 0.05), jnp.ones((c,), jnp.float32))

    return {
        "stem_w": nrm(ks[0], (3, 3, C_IN, C_STEM)),
        "stem_bn": bn(ks[1], C_STEM),
        "exp_w": nrm(ks[2], (C_STEM, C_EXP)),
        "exp_bn": bn(ks[3], C_EXP),
        "dw_w": nrm(ks[4], (3, 3, C_EXP)),
        "dw_bn": bn(ks[5], C_EXP),
        "se_w1": nrm(ks[6], (C_EXP, C_SE)),
        "se_b1": nrm(ks[7], (C_SE,)),
        "se_w2": nrm(ks[8], (C_SE, C_EXP)),
        "se_b2": nrm(ks[9], (C_EXP,)),
        "proj_w": nrm(ks[10], (C_EXP, C_STEM)),
        "proj_bn": bn(ks[11], C_STEM),
        "head_w": nrm(ks[12], (C_STEM, C_HEAD)),
        "head_bn": bn(ks[13], C_HEAD),
        "fc_w": nrm(ks[14], (C_HEAD, NUM_CLASSES)),
        "fc_b": nrm(ks[15], (NUM_CLASSES,)),
    }


def prepare_folded_params(p):
    """Fold eval-mode BN into the weights ONCE (outside the per-forward path).
    Matmul weights are stored bf16 for the MXU; biases/scales stay f32."""
    bf16 = jnp.bfloat16
    f = {}

    sc, sh = _fold_bn(*p["stem_bn"])
    w = p["stem_w"].reshape(K_RAW, C_STEM) * sc[None, :]
    f["stem_w"] = jnp.pad(w, ((0, K_PAD - K_RAW), (0, 0))).astype(bf16)
    f["stem_b"] = sh.reshape(1, C_STEM)

    sc, sh = _fold_bn(*p["exp_bn"])
    f["exp_w"] = (p["exp_w"] * sc[None, :]).astype(bf16)
    f["exp_b"] = sh.reshape(1, C_EXP)

    sc, sh = _fold_bn(*p["dw_bn"])
    f["dw_w"] = p["dw_w"].reshape(9, C_EXP)        # used elementwise: keep f32
    f["dw_s"] = sc.reshape(1, C_EXP)
    f["dw_b"] = sh.reshape(1, C_EXP)

    f["se_w1"] = p["se_w1"].astype(bf16)
    f["se_b1"] = p["se_b1"].reshape(1, C_SE)
    f["se_w2"] = p["se_w2"].astype(bf16)
    f["se_b2"] = p["se_b2"].reshape(1, C_EXP)

    sc, sh = _fold_bn(*p["proj_bn"])
    f["proj_w"] = (p["proj_w"] * sc[None, :]).astype(bf16)
    f["proj_b"] = sh.reshape(1, C_STEM)

    sc, sh = _fold_bn(*p["head_bn"])
    f["head_w"] = (p["head_w"] * sc[None, :]).astype(bf16)
    f["head_b"] = sh.reshape(1, C_HEAD)

    f["fc_w"] = p["fc_w"].astype(bf16)
    f["fc_b"] = p["fc_b"].reshape(1, NUM_CLASSES)
    return f


def _im2col_3x3_s2(x_nhwc):
    """3x3 / stride-2 / SAME im2col (pure data movement); K padded 36 -> 40."""
    B, H, W, C = x_nhwc.shape
    Ho, Wo = H // 2, W // 2
    xp = jnp.pad(x_nhwc, ((0, 0), (1, 1), (1, 1), (0, 0)))
    cols = [xp[:, kh:kh + 2 * Ho:2, kw:kw + 2 * Wo:2, :]
            for kh in range(3) for kw in range(3)]
    patches = jnp.concatenate(cols, axis=-1).reshape(B, Ho * Wo, 9 * C)
    patches = jnp.pad(patches, ((0, 0), (0, 0), (0, K_PAD - 9 * C)))
    return patches, (Ho, Wo)


def constrained_effnet_forward(folded, R_constraint_matrix, x_nchw):
    # ConstrainedEffNet.forward: x = self.constrained_effnet(x); return x.
    # R_constraint_matrix is stored by the module but NOT used in forward().
    del R_constraint_matrix

    # NCHW (PyTorch convention) -> NHWC, then im2col for the stem conv.
    x = jnp.transpose(x_nchw, (0, 2, 3, 1)).astype(jnp.float32)
    B = x.shape[0]
    patches, (Ho, Wo) = _im2col_3x3_s2(x)          # (B, HW, K_PAD)
    HW = Ho * Wo
    pad_top = _round_up(Wo + 1, 8)

    weight_names = ("stem_w", "stem_b", "exp_w", "exp_b",
                    "dw_w", "dw_s", "dw_b",
                    "se_w1", "se_b1", "se_w2", "se_b2",
                    "proj_w", "proj_b", "head_w", "head_b",
                    "fc_w", "fc_b")
    weights = [folded[n] for n in weight_names]

    in_specs = [pl.BlockSpec((1, HW, K_PAD), lambda b: (b, 0, 0))]
    in_specs += [pl.BlockSpec(w.shape, lambda b: (0, 0)) for w in weights]

    logits = pl.pallas_call(
        functools.partial(_fused_effnet_kernel, Ho, Wo),
        grid=(B,),
        in_specs=in_specs,
        out_specs=pl.BlockSpec((1, 1, NUM_CLASSES), lambda b: (b, 0, 0)),
        out_shape=jax.ShapeDtypeStruct((B, 1, NUM_CLASSES), jnp.float32),
        scratch_shapes=[pltpu.VMEM((HW + 2 * pad_top, C_EXP), jnp.float32)],
        compiler_params=pltpu.CompilerParams(
            dimension_semantics=("parallel",),
            vmem_limit_bytes=32 * 1024 * 1024,   # well inside v7x's 64 MiB/TC
        ),
    )(patches, *weights)

    constrained_out = logits.reshape(B, NUM_CLASSES)
    return constrained_out


if __name__ == "__main__":
    key = jax.random.PRNGKey(0)
    pkey, xkey = jax.random.split(key)
    params = init_params(pkey)
    folded = prepare_folded_params(params)     # BN folding done once, not per forward

    # R with unsqueeze(dim=0) -> (1, C, C); stored but unused in forward().
    R = jnp.tril(jnp.ones((NUM_CLASSES, NUM_CLASSES), jnp.float32))[None]
    x = jax.random.normal(xkey, (2, C_IN, 16, 16), jnp.float32)   # NCHW like PyTorch

    fwd = jax.jit(constrained_effnet_forward)
    out = jax.block_until_ready(fwd(folded, R, x))
    assert out.shape == (2, NUM_CLASSES) and out.dtype == jnp.float32
    print("KERNEL_OK")
</pallas_src>

<mosaic_0001>
module attributes {stable_mosaic.version = 11 : i64} {
  func.func @_fused_effnet_kernel(%arg0: i32, %arg1: memref<1x64x40xf32, #tpu.memory_space<vmem>>, %arg2: memref<40x16xbf16, #tpu.memory_space<vmem>>, %arg3: memref<1x16xf32, #tpu.memory_space<vmem>>, %arg4: memref<16x32xbf16, #tpu.memory_space<vmem>>, %arg5: memref<1x32xf32, #tpu.memory_space<vmem>>, %arg6: memref<9x32xf32, #tpu.memory_space<vmem>>, %arg7: memref<1x32xf32, #tpu.memory_space<vmem>>, %arg8: memref<1x32xf32, #tpu.memory_space<vmem>>, %arg9: memref<32x8xbf16, #tpu.memory_space<vmem>>, %arg10: memref<1x8xf32, #tpu.memory_space<vmem>>, %arg11: memref<8x32xbf16, #tpu.memory_space<vmem>>, %arg12: memref<1x32xf32, #tpu.memory_space<vmem>>, %arg13: memref<32x16xbf16, #tpu.memory_space<vmem>>, %arg14: memref<1x16xf32, #tpu.memory_space<vmem>>, %arg15: memref<16x64xbf16, #tpu.memory_space<vmem>>, %arg16: memref<1x64xf32, #tpu.memory_space<vmem>>, %arg17: memref<64x20xbf16, #tpu.memory_space<vmem>>, %arg18: memref<1x20xf32, #tpu.memory_space<vmem>>, %arg19: memref<1x1x20xf32, #tpu.memory_space<vmem>>, %arg20: memref<96x32xf32, #tpu.memory_space<vmem>>) attributes {dimension_semantics = [#tpu.dimension_semantics<parallel>], iteration_bounds = array<i64: 2>, scalar_prefetch = 0 : i64, scratch_operands = 1 : i64, tpu.core_type = #tpu.core_type<tc>, window_params = [{transform_indices = @transform_0, window_bounds = array<i64: 1, 64, 40>}, {pipeline_mode = #tpu.pipeline_mode<synchronous>, transform_indices = @transform_1, window_bounds = array<i64: 40, 16>}, {pipeline_mode = #tpu.pipeline_mode<synchronous>, transform_indices = @transform_2, window_bounds = array<i64: 1, 16>}, {pipeline_mode = #tpu.pipeline_mode<synchronous>, transform_indices = @transform_3, window_bounds = array<i64: 16, 32>}, {pipeline_mode = #tpu.pipeline_mode<synchronous>, transform_indices = @transform_4, window_bounds = array<i64: 1, 32>}, {pipeline_mode = #tpu.pipeline_mode<synchronous>, transform_indices = @transform_5, window_bounds = array<i64: 9, 32>}, {pipeline_mode = #tpu.pipeline_mode<synchronous>, transform_indices = @transform_6, window_bounds = array<i64: 1, 32>}, {pipeline_mode = #tpu.pipeline_mode<synchronous>, transform_indices = @transform_7, window_bounds = array<i64: 1, 32>}, {pipeline_mode = #tpu.pipeline_mode<synchronous>, transform_indices = @transform_8, window_bounds = array<i64: 32, 8>}, {pipeline_mode = #tpu.pipeline_mode<synchronous>, transform_indices = @transform_9, window_bounds = array<i64: 1, 8>}, {pipeline_mode = #tpu.pipeline_mode<synchronous>, transform_indices = @transform_10, window_bounds = array<i64: 8, 32>}, {pipeline_mode = #tpu.pipeline_mode<synchronous>, transform_indices = @transform_11, window_bounds = array<i64: 1, 32>}, {pipeline_mode = #tpu.pipeline_mode<synchronous>, transform_indices = @transform_12, window_bounds = array<i64: 32, 16>}, {pipeline_mode = #tpu.pipeline_mode<synchronous>, transform_indices = @transform_13, window_bounds = array<i64: 1, 16>}, {pipeline_mode = #tpu.pipeline_mode<synchronous>, transform_indices = @transform_14, window_bounds = array<i64: 16, 64>}, {pipeline_mode = #tpu.pipeline_mode<synchronous>, transform_indices = @transform_15, window_bounds = array<i64: 1, 64>}, {pipeline_mode = #tpu.pipeline_mode<synchronous>, transform_indices = @transform_16, window_bounds = array<i64: 64, 20>}, {pipeline_mode = #tpu.pipeline_mode<synchronous>, transform_indices = @transform_17, window_bounds = array<i64: 1, 20>}, {transform_indices = @transform_18, window_bounds = array<i64: 1, 1, 20>}]} {
    %c0 = arith.constant 0 : index
    %c0_0 = arith.constant 0 : index
    %c0_1 = arith.constant 0 : index
    %0 = vector.load %arg1[%c0, %c0_0, %c0_1] : memref<1x64x40xf32, #tpu.memory_space<vmem>>, vector<1x64x40xf32>
    %1 = vector.shape_cast %0 : vector<1x64x40xf32> to vector<64x40xf32>
    %2 = arith.truncf %1 : vector<64x40xf32> to vector<64x40xbf16>
    %c0_2 = arith.constant 0 : index
    %c0_3 = arith.constant 0 : index
    %3 = vector.load %arg2[%c0_2, %c0_3] : memref<40x16xbf16, #tpu.memory_space<vmem>>, vector<40x16xbf16>
    %cst = arith.constant dense<0.000000e+00> : vector<64x16xf32>
    %4 = tpu.matmul %2, %3, %cst {dimension_numbers = #tpu.dot_dimension_numbers<[1], [0], [0], [1], [0, 0, 1, 1], [], []>} : vector<64x40xbf16>, vector<40x16xbf16>, vector<64x16xf32> -> vector<64x16xf32>
    %c0_4 = arith.constant 0 : index
    %c0_5 = arith.constant 0 : index
    %5 = vector.load %arg3[%c0_4, %c0_5] : memref<1x16xf32, #tpu.memory_space<vmem>>, vector<1x16xf32>
    %6 = vector.broadcast %5 : vector<1x16xf32> to vector<64x16xf32>
    %7 = arith.addf %4, %6 : vector<64x16xf32>
    %8 = arith.negf %7 : vector<64x16xf32>
    %9 = math.exp %8 : vector<64x16xf32>
    %cst_6 = arith.constant 1.000000e+00 : f32
    %10 = vector.broadcast %cst_6 : f32 to vector<64x16xf32>
    %11 = arith.addf %10, %9 : vector<64x16xf32>
    %12 = arith.divf %10, %11 : vector<64x16xf32>
    %13 = arith.mulf %7, %12 : vector<64x16xf32>
    %14 = arith.truncf %13 : vector<64x16xf32> to vector<64x16xbf16>
    %c0_7 = arith.constant 0 : index
    %c0_8 = arith.constant 0 : index
    %15 = vector.load %arg4[%c0_7, %c0_8] : memref<16x32xbf16, #tpu.memory_space<vmem>>, vector<16x32xbf16>
    %cst_9 = arith.constant dense<0.000000e+00> : vector<64x32xf32>
    %16 = tpu.matmul %14, %15, %cst_9 {dimension_numbers = #tpu.dot_dimension_numbers<[1], [0], [0], [1], [0, 0, 1, 1], [], []>} : vector<64x16xbf16>, vector<16x32xbf16>, vector<64x32xf32> -> vector<64x32xf32>
    %c0_10 = arith.constant 0 : index
    %c0_11 = arith.constant 0 : index
    %17 = vector.load %arg5[%c0_10, %c0_11] : memref<1x32xf32, #tpu.memory_space<vmem>>, vector<1x32xf32>
    %18 = vector.broadcast %17 : vector<1x32xf32> to vector<64x32xf32>
    %19 = arith.addf %16, %18 : vector<64x32xf32>
    %20 = arith.negf %19 : vector<64x32xf32>
    %21 = math.exp %20 : vector<64x32xf32>
    %cst_12 = arith.constant 1.000000e+00 : f32
    %22 = vector.broadcast %cst_12 : f32 to vector<64x32xf32>
    %23 = arith.addf %22, %21 : vector<64x32xf32>
    %24 = arith.divf %22, %23 : vector<64x32xf32>
    %25 = arith.mulf %19, %24 : vector<64x32xf32>
    %cst_13 = arith.constant 0.000000e+00 : f32
    %26 = vector.broadcast %cst_13 : f32 to vector<96x32xf32>
    %c0_14 = arith.constant 0 : index
    %c0_15 = arith.constant 0 : index
    %27 = vector.load %arg20[%c0_14, %c0_15] : memref<96x32xf32, #tpu.memory_space<vmem>>, vector<96x32xf32>
    tpu.vector_store %arg20[%c0_14, %c0_15], %26 {strides = array<i32>} : memref<96x32xf32, #tpu.memory_space<vmem>>, vector<96x32xf32>,
    %c16 = arith.constant 16 : index
    %c0_16 = arith.constant 0 : index
    %28 = vector.load %arg20[%c16, %c0_16] : memref<96x32xf32, #tpu.memory_space<vmem>>, vector<64x32xf32>
    tpu.vector_store %arg20[%c16, %c0_16], %25 {strides = array<i32>} : memref<96x32xf32, #tpu.memory_space<vmem>>, vector<64x32xf32>,
    %29 = tpu.iota {dimensions = array<i32: 0>} : vector<64x32xi32>
    %c8_i32 = arith.constant 8 : i32
    %c0_i32 = arith.constant 0 : i32
    %30 = arith.cmpi eq, %c8_i32, %c0_i32 : i32
    %c1_i32 = arith.constant 1 : i32
    %31 = arith.select %30, %c1_i32, %c8_i32 : i32
    %32 = vector.broadcast %31 : i32 to vector<64x32xi32>
    %33 = arith.remsi %29, %32 : vector<64x32xi32>
    %c0_i32_17 = arith.constant 0 : i32
    %34 = vector.broadcast %c0_i32_17 : i32 to vector<64x32xi32>
    %35 = arith.cmpi ne, %33, %34 : vector<64x32xi32>
    %c0_i32_18 = arith.constant 0 : i32
    %36 = vector.broadcast %c0_i32_18 : i32 to vector<64x32xi32>
    %37 = arith.cmpi slt, %33, %36 : vector<64x32xi32>
    %c0_i32_19 = arith.constant 0 : i32
    %38 = arith.cmpi slt, %31, %c0_i32_19 : i32
    %39 = vector.broadcast %38 : i1 to vector<64x32xi1>
    %40 = vector.broadcast %39 : vector<64x32xi1> to vector<64x32xi1>
    %41 = arith.xori %37, %40 : vector<64x32xi1>
    %42 = arith.andi %41, %35 : vector<64x32xi1>
    %43 = vector.broadcast %31 : i32 to vector<64x32xi32>
    %44 = arith.addi %33, %43 : vector<64x32xi32>
    %45 = arith.select %42, %44, %33 : vector<64x32xi1>, vector<64x32xi32>
    %c1_i32_20 = arith.constant 1 : i32
    %46 = vector.broadcast %c1_i32_20 : i32 to vector<64x32xi32>
    %47 = arith.cmpi sge, %45, %46 : vector<64x32xi32>
    %48 = arith.extui %47 : vector<64x32xi1> to vector<64x32xi32>
    %49 = arith.sitofp %48 : vector<64x32xi32> to vector<64x32xf32>
    %c6_i32 = arith.constant 6 : i32
    %50 = vector.broadcast %c6_i32 : i32 to vector<64x32xi32>
    %51 = arith.cmpi sle, %45, %50 : vector<64x32xi32>
    %52 = arith.extui %51 : vector<64x32xi1> to vector<64x32xi32>
    %53 = arith.sitofp %52 : vector<64x32xi32> to vector<64x32xf32>
    %cst_21 = arith.constant 0.000000e+00 : f32
    %54 = vector.broadcast %cst_21 : f32 to vector<64x32xf32>
    %c7 = arith.constant 7 : index
    %c0_22 = arith.constant 0 : index
    %55 = vector.load %arg20[%c7, %c0_22] : memref<96x32xf32, #tpu.memory_space<vmem>>, vector<64x32xf32>
    %56 = arith.mulf %55, %49 : vector<64x32xf32>
    %c0_23 = arith.constant 0 : index
    %c0_24 = arith.constant 0 : index
    %57 = vector.load %arg6[%c0_23, %c0_24] : memref<9x32xf32, #tpu.memory_space<vmem>>, vector<1x32xf32>
    %58 = vector.broadcast %57 : vector<1x32xf32> to vector<64x32xf32>
    %59 = arith.mulf %56, %58 : vector<64x32xf32>
    %60 = arith.addf %54, %59 : vector<64x32xf32>
    %c8 = arith.constant 8 : index
    %c0_25 = arith.constant 0 : index
    %61 = vector.load %arg20[%c8, %c0_25] : memref<96x32xf32, #tpu.memory_space<vmem>>, vector<64x32xf32>
    %c1 = arith.constant 1 : index
    %c0_26 = arith.constant 0 : index
    %62 = vector.load %arg6[%c1, %c0_26] : memref<9x32xf32, #tpu.memory_space<vmem>>, vector<1x32xf32>
    %63 = vector.broadcast %62 : vector<1x32xf32> to vector<64x32xf32>
    %64 = arith.mulf %61, %63 : vector<64x32xf32>
    %65 = arith.addf %60, %64 : vector<64x32xf32>
    %c9 = arith.constant 9 : index
    %c0_27 = arith.constant 0 : index
    %66 = vector.load %arg20[%c9, %c0_27] : memref<96x32xf32, #tpu.memory_space<vmem>>, vector<64x32xf32>
    %67 = arith.mulf %66, %53 : vector<64x32xf32>
    %c2 = arith.constant 2 : index
    %c0_28 = arith.constant 0 : index
    %68 = vector.load %arg6[%c2, %c0_28] : memref<9x32xf32, #tpu.memory_space<vmem>>, vector<1x32xf32>
    %69 = vector.broadcast %68 : vector<1x32xf32> to vector<64x32xf32>
    %70 = arith.mulf %67, %69 : vector<64x32xf32>
    %71 = arith.addf %65, %70 : vector<64x32xf32>
    %c15 = arith.constant 15 : index
    %c0_29 = arith.constant 0 : index
    %72 = vector.load %arg20[%c15, %c0_29] : memref<96x32xf32, #tpu.memory_space<vmem>>, vector<64x32xf32>
    %73 = arith.mulf %72, %49 : vector<64x32xf32>
    %c3 = arith.constant 3 : index
    %c0_30 = arith.constant 0 : index
    %74 = vector.load %arg6[%c3, %c0_30] : memref<9x32xf32, #tpu.memory_space<vmem>>, vector<1x32xf32>
    %75 = vector.broadcast %74 : vector<1x32xf32> to vector<64x32xf32>
    %76 = arith.mulf %73, %75 : vector<64x32xf32>
    %77 = arith.addf %71, %76 : vector<64x32xf32>
    %c16_31 = arith.constant 16 : index
    %c0_32 = arith.constant 0 : index
    %78 = vector.load %arg20[%c16_31, %c0_32] : memref<96x32xf32, #tpu.memory_space<vmem>>, vector<64x32xf32>
    %c4 = arith.constant 4 : index
    %c0_33 = arith.constant 0 : index
    %79 = vector.load %arg6[%c4, %c0_33] : memref<9x32xf32, #tpu.memory_space<vmem>>, vector<1x32xf32>
    %80 = vector.broadcast %79 : vector<1x32xf32> to vector<64x32xf32>
    %81 = arith.mulf %78, %80 : vector<64x32xf32>
    %82 = arith.addf %77, %81 : vector<64x32xf32>
    %c17 = arith.constant 17 : index
    %c0_34 = arith.constant 0 : index
    %83 = vector.load %arg20[%c17, %c0_34] : memref<96x32xf32, #tpu.memory_space<vmem>>, vector<64x32xf32>
    %84 = arith.mulf %83, %53 : vector<64x32xf32>
    %c5 = arith.constant 5 : index
    %c0_35 = arith.constant 0 : index
    %85 = vector.load %arg6[%c5, %c0_35] : memref<9x32xf32, #tpu.memory_space<vmem>>, vector<1x32xf32>
    %86 = vector.broadcast %85 : vector<1x32xf32> to vector<64x32xf32>
    %87 = arith.mulf %84, %86 : vector<64x32xf32>
    %88 = arith.addf %82, %87 : vector<64x32xf32>
    %c23 = arith.constant 23 : index
    %c0_36 = arith.constant 0 : index
    %89 = vector.load %arg20[%c23, %c0_36] : memref<96x32xf32, #tpu.memory_space<vmem>>, vector<64x32xf32>
    %90 = arith.mulf %89, %49 : vector<64x32xf32>
    %c6 = arith.constant 6 : index
    %c0_37 = arith.constant 0 : index
    %91 = vector.load %arg6[%c6, %c0_37] : memref<9x32xf32, #tpu.memory_space<vmem>>, vector<1x32xf32>
    %92 = vector.broadcast %91 : vector<1x32xf32> to vector<64x32xf32>
    %93 = arith.mulf %90, %92 : vector<64x32xf32>
    %94 = arith.addf %88, %93 : vector<64x32xf32>
    %c24 = arith.constant 24 : index
    %c0_38 = arith.constant 0 : index
    %95 = vector.load %arg20[%c24, %c0_38] : memref<96x32xf32, #tpu.memory_space<vmem>>, vector<64x32xf32>
    %c7_39 = arith.constant 7 : index
    %c0_40 = arith.constant 0 : index
    %96 = vector.load %arg6[%c7_39, %c0_40] : memref<9x32xf32, #tpu.memory_space<vmem>>, vector<1x32xf32>
    %97 = vector.broadcast %96 : vector<1x32xf32> to vector<64x32xf32>
    %98 = arith.mulf %95, %97 : vector<64x32xf32>
    %99 = arith.addf %94, %98 : vector<64x32xf32>
    %c25 = arith.constant 25 : index
    %c0_41 = arith.constant 0 : index
    %100 = vector.load %arg20[%c25, %c0_41] : memref<96x32xf32, #tpu.memory_space<vmem>>, vector<64x32xf32>
    %101 = arith.mulf %100, %53 : vector<64x32xf32>
    %c8_42 = arith.constant 8 : index
    %c0_43 = arith.constant 0 : index
    %102 = vector.load %arg6[%c8_42, %c0_43] : memref<9x32xf32, #tpu.memory_space<vmem>>, vector<1x32xf32>
    %103 = vector.broadcast %102 : vector<1x32xf32> to vector<64x32xf32>
    %104 = arith.mulf %101, %103 : vector<64x32xf32>
    %105 = arith.addf %99, %104 : vector<64x32xf32>
    %c0_44 = arith.constant 0 : index
    %c0_45 = arith.constant 0 : index
    %106 = vector.load %arg7[%c0_44, %c0_45] : memref<1x32xf32, #tpu.memory_space<vmem>>, vector<1x32xf32>
    %107 = vector.broadcast %106 : vector<1x32xf32> to vector<64x32xf32>
    %108 = arith.mulf %105, %107 : vector<64x32xf32>
    %c0_46 = arith.constant 0 : index
    %c0_47 = arith.constant 0 : index
    %109 = vector.load %arg8[%c0_46, %c0_47] : memref<1x32xf32, #tpu.memory_space<vmem>>, vector<1x32xf32>
    %110 = vector.broadcast %109 : vector<1x32xf32> to vector<64x32xf32>
    %111 = arith.addf %108, %110 : vector<64x32xf32>
    %112 = arith.negf %111 : vector<64x32xf32>
    %113 = math.exp %112 : vector<64x32xf32>
    %cst_48 = arith.constant 1.000000e+00 : f32
    %114 = vector.broadcast %cst_48 : f32 to vector<64x32xf32>
    %115 = arith.addf %114, %113 : vector<64x32xf32>
    %116 = arith.divf %114, %115 : vector<64x32xf32>
    %117 = arith.mulf %111, %116 : vector<64x32xf32>
    %cst_49 = arith.constant dense<0.000000e+00> : vector<32xf32>
    %118 = vector.multi_reduction <add>, %117, %cst_49 [0] : vector<64x32xf32> to vector<32xf32>
    %119 = vector.shape_cast %118 : vector<32xf32> to vector<1x32xf32>
    %cst_50 = arith.constant 6.400000e+01 : f32
    %120 = vector.broadcast %cst_50 : f32 to vector<1x32xf32>
    %121 = arith.divf %119, %120 : vector<1x32xf32>
    %122 = arith.truncf %121 : vector<1x32xf32> to vector<1x32xbf16>
    %c0_51 = arith.constant 0 : index
    %c0_52 = arith.constant 0 : index
    %123 = vector.load %arg9[%c0_51, %c0_52] : memref<32x8xbf16, #tpu.memory_space<vmem>>, vector<32x8xbf16>
    %cst_53 = arith.constant dense<0.000000e+00> : vector<1x8xf32>
    %124 = tpu.matmul %122, %123, %cst_53 {dimension_numbers = #tpu.dot_dimension_numbers<[1], [0], [0], [1], [0, 0, 1, 1], [], []>} : vector<1x32xbf16>, vector<32x8xbf16>, vector<1x8xf32> -> vector<1x8xf32>
    %c0_54 = arith.constant 0 : index
    %c0_55 = arith.constant 0 : index
    %125 = vector.load %arg10[%c0_54, %c0_55] : memref<1x8xf32, #tpu.memory_space<vmem>>, vector<1x8xf32>
    %126 = arith.addf %124, %125 : vector<1x8xf32>
    %127 = arith.negf %126 : vector<1x8xf32>
    %128 = math.exp %127 : vector<1x8xf32>
    %cst_56 = arith.constant 1.000000e+00 : f32
    %129 = vector.broadcast %cst_56 : f32 to vector<1x8xf32>
    %130 = arith.addf %129, %128 : vector<1x8xf32>
    %131 = arith.divf %129, %130 : vector<1x8xf32>
    %132 = arith.mulf %126, %131 : vector<1x8xf32>
    %133 = arith.truncf %132 : vector<1x8xf32> to vector<1x8xbf16>
    %c0_57 = arith.constant 0 : index
    %c0_58 = arith.constant 0 : index
    %134 = vector.load %arg11[%c0_57, %c0_58] : memref<8x32xbf16, #tpu.memory_space<vmem>>, vector<8x32xbf16>
    %cst_59 = arith.constant dense<0.000000e+00> : vector<1x32xf32>
    %135 = tpu.matmul %133, %134, %cst_59 {dimension_numbers = #tpu.dot_dimension_numbers<[1], [0], [0], [1], [0, 0, 1, 1], [], []>} : vector<1x8xbf16>, vector<8x32xbf16>, vector<1x32xf32> -> vector<1x32xf32>
    %c0_60 = arith.constant 0 : index
    %c0_61 = arith.constant 0 : index
    %136 = vector.load %arg12[%c0_60, %c0_61] : memref<1x32xf32, #tpu.memory_space<vmem>>, vector<1x32xf32>
    %137 = arith.addf %135, %136 : vector<1x32xf32>
    %138 = arith.negf %137 : vector<1x32xf32>
    %139 = math.exp %138 : vector<1x32xf32>
    %cst_62 = arith.constant 1.000000e+00 : f32
    %140 = vector.broadcast %cst_62 : f32 to vector<1x32xf32>
    %141 = arith.addf %140, %139 : vector<1x32xf32>
    %142 = arith.divf %140, %141 : vector<1x32xf32>
    %143 = vector.broadcast %142 : vector<1x32xf32> to vector<64x32xf32>
    %144 = arith.mulf %117, %143 : vector<64x32xf32>
    %145 = arith.truncf %144 : vector<64x32xf32> to vector<64x32xbf16>
    %c0_63 = arith.constant 0 : index
    %c0_64 = arith.constant 0 : index
    %146 = vector.load %arg13[%c0_63, %c0_64] : memref<32x16xbf16, #tpu.memory_space<vmem>>, vector<32x16xbf16>
    %cst_65 = arith.constant dense<0.000000e+00> : vector<64x16xf32>
    %147 = tpu.matmul %145, %146, %cst_65 {dimension_numbers = #tpu.dot_dimension_numbers<[1], [0], [0], [1], [0, 0, 1, 1], [], []>} : vector<64x32xbf16>, vector<32x16xbf16>, vector<64x16xf32> -> vector<64x16xf32>
    %c0_66 = arith.constant 0 : index
    %c0_67 = arith.constant 0 : index
    %148 = vector.load %arg14[%c0_66, %c0_67] : memref<1x16xf32, #tpu.memory_space<vmem>>, vector<1x16xf32>
    %149 = vector.broadcast %148 : vector<1x16xf32> to vector<64x16xf32>
    %150 = arith.addf %147, %149 : vector<64x16xf32>
    %151 = arith.addf %150, %13 : vector<64x16xf32>
    %152 = arith.truncf %151 : vector<64x16xf32> to vector<64x16xbf16>
    %c0_68 = arith.constant 0 : index
    %c0_69 = arith.constant 0 : index
    %153 = vector.load %arg15[%c0_68, %c0_69] : memref<16x64xbf16, #tpu.memory_space<vmem>>, vector<16x64xbf16>
    %cst_70 = arith.constant dense<0.000000e+00> : vector<64x64xf32>
    %154 = tpu.matmul %152, %153, %cst_70 {dimension_numbers = #tpu.dot_dimension_numbers<[1], [0], [0], [1], [0, 0, 1, 1], [], []>} : vector<64x16xbf16>, vector<16x64xbf16>, vector<64x64xf32> -> vector<64x64xf32>
    %c0_71 = arith.constant 0 : index
    %c0_72 = arith.constant 0 : index
    %155 = vector.load %arg16[%c0_71, %c0_72] : memref<1x64xf32, #tpu.memory_space<vmem>>, vector<1x64xf32>
    %156 = vector.broadcast %155 : vector<1x64xf32> to vector<64x64xf32>
    %157 = arith.addf %154, %156 : vector<64x64xf32>
    %158 = arith.negf %157 : vector<64x64xf32>
    %159 = math.exp %158 : vector<64x64xf32>
    %cst_73 = arith.constant 1.000000e+00 : f32
    %160 = vector.broadcast %cst_73 : f32 to vector<64x64xf32>
    %161 = arith.addf %160, %159 : vector<64x64xf32>
    %162 = arith.divf %160, %161 : vector<64x64xf32>
    %163 = arith.mulf %157, %162 : vector<64x64xf32>
    %cst_74 = arith.constant dense<0.000000e+00> : vector<64xf32>
    %164 = vector.multi_reduction <add>, %163, %cst_74 [0] : vector<64x64xf32> to vector<64xf32>
    %165 = vector.shape_cast %164 : vector<64xf32> to vector<1x64xf32>
    %cst_75 = arith.constant 6.400000e+01 : f32
    %166 = vector.broadcast %cst_75 : f32 to vector<1x64xf32>
    %167 = arith.divf %165, %166 : vector<1x64xf32>
    %168 = arith.truncf %167 : vector<1x64xf32> to vector<1x64xbf16>
    %c0_76 = arith.constant 0 : index
    %c0_77 = arith.constant 0 : index
    %169 = vector.load %arg17[%c0_76, %c0_77] : memref<64x20xbf16, #tpu.memory_space<vmem>>, vector<64x20xbf16>
    %cst_78 = arith.constant dense<0.000000e+00> : vector<1x20xf32>
    %170 = tpu.matmul %168, %169, %cst_78 {dimension_numbers = #tpu.dot_dimension_numbers<[1], [0], [0], [1], [0, 0, 1, 1], [], []>} : vector<1x64xbf16>, vector<64x20xbf16>, vector<1x20xf32> -> vector<1x20xf32>
    %c0_79 = arith.constant 0 : index
    %c0_80 = arith.constant 0 : index
    %171 = vector.load %arg18[%c0_79, %c0_80] : memref<1x20xf32, #tpu.memory_space<vmem>>, vector<1x20xf32>
    %172 = arith.addf %170, %171 : vector<1x20xf32>
    %173 = vector.shape_cast %172 : vector<1x20xf32> to vector<1x1x20xf32>
    %c0_81 = arith.constant 0 : index
    %c0_82 = arith.constant 0 : index
    %c0_83 = arith.constant 0 : index
    %174 = vector.load %arg19[%c0_81, %c0_82, %c0_83] : memref<1x1x20xf32, #tpu.memory_space<vmem>>, vector<1x1x20xf32>
    tpu.vector_store %arg19[%c0_81, %c0_82, %c0_83], %173 {strides = array<i32>} : memref<1x1x20xf32, #tpu.memory_space<vmem>>, vector<1x1x20xf32>,
    return
  }
  func.func @transform_0(%arg0: i32) -> (i32, i32, i32) {
    %c0_i32 = arith.constant 0 : i32
    %c0_i32_0 = arith.constant 0 : i32
    %c0_i32_1 = arith.constant 0 : i32
    return %arg0, %c0_i32, %c0_i32_0 : i32, i32, i32
  }
  func.func @transform_1(%arg0: i32) -> (i32, i32) {
    %c0_i32 = arith.constant 0 : i32
    %c0_i32_0 = arith.constant 0 : i32
    %c0_i32_1 = arith.constant 0 : i32
    return %c0_i32, %c0_i32_0 : i32, i32
  }
  func.func @transform_2(%arg0: i32) -> (i32, i32) {
    %c0_i32 = arith.constant 0 : i32
    %c0_i32_0 = arith.constant 0 : i32
    %c0_i32_1 = arith.constant 0 : i32
    return %c0_i32, %c0_i32_0 : i32, i32
  }
  func.func @transform_3(%arg0: i32) -> (i32, i32) {
    %c0_i32 = arith.constant 0 : i32
    %c0_i32_0 = arith.constant 0 : i32
    %c0_i32_1 = arith.constant 0 : i32
    return %c0_i32, %c0_i32_0 : i32, i32
  }
  func.func @transform_4(%arg0: i32) -> (i32, i32) {
    %c0_i32 = arith.constant 0 : i32
    %c0_i32_0 = arith.constant 0 : i32
    %c0_i32_1 = arith.constant 0 : i32
    return %c0_i32, %c0_i32_0 : i32, i32
  }
  func.func @transform_5(%arg0: i32) -> (i32, i32) {
    %c0_i32 = arith.constant 0 : i32
    %c0_i32_0 = arith.constant 0 : i32
    %c0_i32_1 = arith.constant 0 : i32
    return %c0_i32, %c0_i32_0 : i32, i32
  }
  func.func @transform_6(%arg0: i32) -> (i32, i32) {
    %c0_i32 = arith.constant 0 : i32
    %c0_i32_0 = arith.constant 0 : i32
    %c0_i32_1 = arith.constant 0 : i32
    return %c0_i32, %c0_i32_0 : i32, i32
  }
  func.func @transform_7(%arg0: i32) -> (i32, i32) {
    %c0_i32 = arith.constant 0 : i32
    %c0_i32_0 = arith.constant 0 : i32
    %c0_i32_1 = arith.constant 0 : i32
    return %c0_i32, %c0_i32_0 : i32, i32
  }
  func.func @transform_8(%arg0: i32) -> (i32, i32) {
    %c0_i32 = arith.constant 0 : i32
    %c0_i32_0 = arith.constant 0 : i32
    %c0_i32_1 = arith.constant 0 : i32
    return %c0_i32, %c0_i32_0 : i32, i32
  }
  func.func @transform_9(%arg0: i32) -> (i32, i32) {
    %c0_i32 = arith.constant 0 : i32
    %c0_i32_0 = arith.constant 0 : i32
    %c0_i32_1 = arith.constant 0 : i32
    return %c0_i32, %c0_i32_0 : i32, i32
  }
  func.func @transform_10(%arg0: i32) -> (i32, i32) {
    %c0_i32 = arith.constant 0 : i32
    %c0_i32_0 = arith.constant 0 : i32
    %c0_i32_1 = arith.constant 0 : i32
    return %c0_i32, %c0_i32_0 : i32, i32
  }
  func.func @transform_11(%arg0: i32) -> (i32, i32) {
    %c0_i32 = arith.constant 0 : i32
    %c0_i32_0 = arith.constant 0 : i32
    %c0_i32_1 = arith.constant 0 : i32
    return %c0_i32, %c0_i32_0 : i32, i32
  }
  func.func @transform_12(%arg0: i32) -> (i32, i32) {
    %c0_i32 = arith.constant 0 : i32
    %c0_i32_0 = arith.constant 0 : i32
    %c0_i32_1 = arith.constant 0 : i32
    return %c0_i32, %c0_i32_0 : i32, i32
  }
  func.func @transform_13(%arg0: i32) -> (i32, i32) {
    %c0_i32 = arith.constant 0 : i32
    %c0_i32_0 = arith.constant 0 : i32
    %c0_i32_1 = arith.constant 0 : i32
    return %c0_i32, %c0_i32_0 : i32, i32
  }
  func.func @transform_14(%arg0: i32) -> (i32, i32) {
    %c0_i32 = arith.constant 0 : i32
    %c0_i32_0 = arith.constant 0 : i32
    %c0_i32_1 = arith.constant 0 : i32
    return %c0_i32, %c0_i32_0 : i32, i32
  }
  func.func @transform_15(%arg0: i32) -> (i32, i32) {
    %c0_i32 = arith.constant 0 : i32
    %c0_i32_0 = arith.constant 0 : i32
    %c0_i32_1 = arith.constant 0 : i32
    return %c0_i32, %c0_i32_0 : i32, i32
  }
  func.func @transform_16(%arg0: i32) -> (i32, i32) {
    %c0_i32 = arith.constant 0 : i32
    %c0_i32_0 = arith.constant 0 : i32
    %c0_i32_1 = arith.constant 0 : i32
    return %c0_i32, %c0_i32_0 : i32, i32
  }
  func.func @transform_17(%arg0: i32) -> (i32, i32) {
    %c0_i32 = arith.constant 0 : i32
    %c0_i32_0 = arith.constant 0 : i32
    %c0_i32_1 = arith.constant 0 : i32
    return %c0_i32, %c0_i32_0 : i32, i32
  }
  func.func @transform_18(%arg0: i32) -> (i32, i32, i32) {
    %c0_i32 = arith.constant 0 : i32
    %c0_i32_0 = arith.constant 0 : i32
    %c0_i32_1 = arith.constant 0 : i32
    return %arg0, %c0_i32, %c0_i32_0 : i32, i32, i32
  }
}

</mosaic_0001>

<bundles_post_ra>
// kernel: constrained_effnet_forward.1
= control target key start
LH: loop header
LB: loop body
LE: loop exit
PB: predicated region body
PF: predicated region fallthrough
CT: control target
= control target key end

     0   :  { %s3315_s0 = inlined_call_operand.vmem [shape: f32[2,64,40], index: 0, kind: input, shape index: {}]   ;;  %s3316_s1 = inlined_call_operand.vmem [shape: bf16[40,16], index: 1, kind: input, shape index: {}]   ;;  %s3317_s2 = inlined_call_operand.vmem [shape: f32[1,16], index: 2, kind: input, shape index: {}]   ;;  %s3318_s3 = inlined_call_operand.vmem [shape: bf16[16,32], index: 3, kind: input, shape index: {}]   ;;  %s3319_s4 = inlined_call_operand.vmem [shape: f32[1,32], index: 4, kind: input, shape index: {}]   ;;  %s3320_s5 = inlined_call_operand.vmem [shape: f32[9,32], index: 5, kind: input, shape index: {}]   ;;  %s3321_s6 = inlined_call_operand.vmem [shape: f32[1,32], index: 6, kind: input, shape index: {}]   ;;  %s3322_s7 = inlined_call_operand.vmem [shape: f32[1,32], index: 7, kind: input, shape index: {}]   ;;  %s3323_s8 = inlined_call_operand.vmem [shape: bf16[32,8], index: 8, kind: input, shape index: {}]   ;;  %s3324_s9 = inlined_call_operand.vmem [shape: f32[1,8], index: 9, kind: input, shape index: {}]   ;;  %s3325_s10 = inlined_call_operand.vmem [shape: bf16[8,32], index: 10, kind: input, shape index: {}]   ;;  %s3326_s11 = inlined_call_operand.vmem [shape: f32[1,32], index: 11, kind: input, shape index: {}]   ;;  %s3327_s12 = inlined_call_operand.vmem [shape: bf16[32,16], index: 12, kind: input, shape index: {}]   ;;  %s3328_s13 = inlined_call_operand.vmem [shape: f32[1,16], index: 13, kind: input, shape index: {}]   ;;  %s3329_s14 = inlined_call_operand.vmem [shape: bf16[16,64], index: 14, kind: input, shape index: {}]   ;;  %s3330_s15 = inlined_call_operand.vmem [shape: f32[1,64], index: 15, kind: input, shape index: {}]   ;;  %s3331_s16 = inlined_call_operand.vmem [shape: bf16[64,20], index: 16, kind: input, shape index: {}]   ;;  %s3332_s17 = inlined_call_operand.vmem [shape: f32[1,20], index: 17, kind: input, shape index: {}]   ;;  %s3333_s18 = inlined_call_operand.hbm [shape: f32[2,1,20], index: 18, kind: output, shape index: {}]  }
   0x1   :  { %3348 = sst [smem:[#allocation17_spill]] %s3315_s0 }
   0x2   :  { %3349 = sst [smem:[#allocation18_spill]] %s3316_s1 }
   0x3   :  { %3350 = sst [smem:[#allocation19_spill]] %s3317_s2 }
   0x4   :  { %23 = vsyncpa [#allocation4], 0 }
   0x5   :  { %25 = vsyncpa [#allocation4 + $0x1], 0  ;;  %s2589_s27 = smov 0   ;;  %s2591_s28 = smov 0  }
   0x6   :  { %s2593_s29 = smov 0   ;;  %s2595_s30 = smov 0  }
   0x7 LB: > { %3351 = sst [smem:[#allocation6_spill]] %s2477_s27  ;;  %s2610_s0 = sadd.s32 4294967295, %s2489_s30   ;;  %s2489_s30 = sphi %s2595_s30, %s3398_s30   ;;  %s2485_s29 = sphi %s2593_s29, %s3400_s29   ;;  %s2481_s28 = sphi %s2591_s28, %s3402_s28   ;;  %s2477_s27 = sphi %s2589_s27, %s3401_s27  }
   0x8   : > { %3352 = sst [smem:[#allocation7_spill]] %s2485_s29  ;;  %s2024_s19 = sadd.s32 4294967294, %s2489_s30  }
   0x9   : > { %s2614_s1 = sadd.s32 1, %s2489_s30   ;;  %s421_s20 = sadd.s32 1, %s2485_s29 }
   0xa   : > { %3353 = sst [smem:[#allocation8_spill]] %s2614_s1  ;;  %s418_s21 = ssub.s32 %s2489_s30, %s2614_s1 }
   0xb   : > { %p431_p0 = scmp.ne.s32.totalorder %s2485_s29, %s2481_s28  ;;  %p419_p1 = scmp.eq.s32.totalorder %s418_s21, 0 }
   0xc   : > { %p432_p2 = scmp.eq.s32.totalorder %s2610_s0, 1  ;;  %p437_p3 = scmp.ne.s32.totalorder %s2481_s28, %s2477_s27 }
   0xd   : > { %p438_p4 = scmp.eq.s32.totalorder %s2024_s19, 1  ;;  %p2027_p7 = scmp.ge.s32.totalorder %s2489_s30, 1 }
   0xe   : > { %s2625_s22 = scalar_select %p419_p1, %s2485_s29, %s421_s20  }
   0xf   : > { %p2627_p5 = por %p432_p2, %p431_p0  ;;  %p2631_p6 = por %p438_p4, %p437_p3 }
  0x10   : > { %3354 = sst [smem:[#allocation9_spill]] %s2625_s22  ;;  %p515_p8 = scmp.lt.s32.totalorder %s2489_s30, 3 }
  0x11   : > { %s3356_s23 = scalar_select %p2631_p6, 1, 0 }
  0x12   : > { %p516_p9 = pnand %p2027_p7, %p515_p8 }
  0x13   : > { %3357 = sst [smem:[#allocation10_spill]] %s3356_s23 }
  0x14   : > { %519 = sbr.rel (%p516_p9) target bundleno = 1870 (0x74e), region = 92 }
  0x1b   : > { %s3358_s26 = sld [smem:[#allocation18_spill]]  ;;  %p568_p10 = scmp.lt.s32.totalorder %s2610_s0, 1  ;;  %vm626_vm0 = vcmask 1043456   ;;  %vm613_vm1 = vcmask 326656   ;;  %v2281_v16 = vld [vmem:[%s3318_s3] sm:$0xff]   ;;  %vm770_vm2 = vcmask 130048  }
  0x1c   : > { %s3359_s25 = sld [smem:[#allocation17_spill]]  ;;  %2178 = vmatprep.subr.bf16.mxu1 %v2281_v16  ;;  %s3360_s19 = sld [smem:[#allocation19_spill]]  ;;  %vm904_vm3 = vcmask 261120   ;;  %vm2492_vm4 = vmmov 0  }
  0x1d   : > { %s569_s21 = scalar_select %p568_p10, %s2610_s0, 1  ;;  %2179 = vmatpush3.bf16.msra.mxu1 %v2281_v16  ;;  %v2283_v16 = vld [vmem:[%s3323_s8 + $0x8] sm:$0xff]  }
  0x1e   : > { %s2127_s29 = sshll.u32 %s2610_s0, 4  ;;  %s2493_s24 = smov [#allocation3]  }
  0x1f   : > { %s2130_s1 = sshll.u32 %s569_s21, 6  ;;  %s566_s21 = sand.u32 1, %s2481_s28  }
  0x20   : > { %s1957_s0 = scalar_lea.sflag [#allocation4], %s566_s21 }
  0x21   : > { %v2278_v0 = vld [vmem:[%s3358_s26] sm:$0xff]   ;;  %v2279_v1 = vld [vmem:[%s3358_s26 + $0x8] sm:$0xff]   ;;  %v2280_v2 = vld [vmem:[%s3358_s26 + $0x10] ss:$0 sps:$4 sm:$0xff]  }
  0x22   : > { %2164 = vmatprep.subr.bf16.mxu0 %v2278_v0  ;;  %s572_s27 = scalar_lea.vmem %s3359_s25, %s2130_s1  ;;  %v628_v6 = vsel %vm626_vm0, %v2280_v2, 0  ;;  %v2030_v17 = vld [vmem:[%s3360_s19] ss:$0 sm:$0xff]  ;;  %s567_s1 = scalar_lea.vmem [#allocation3], %s566_s21 }
  0x23   : > { %2165 = vmatpush3.bf16.msra.mxu0 %v2278_v0  ;;  %v574_v3 = vld [vmem:[%s572_s27] sm:$0xff]  ;;  %v575_v4 = vld [vmem:[%s572_s27 + $0x8] sm:$0xff]  ;;  %v576_v5 = vld [vmem:[%s572_s27 + $0x10] sm:$0xff]  ;;  %s1969_s22 = sshll.u32 %s567_s1, 4  ;;  %s2431_s25 = sshll.u32 %s2493_s24, 4  ;;  %s3275_s22 = int_to_ptr.vmem [resolvable:$true] %s1969_s22  ;;  %s2432_s25 = int_to_ptr.vmem [resolvable:$false] %s2431_s25 }
  0x24   : > { %2166 = vmatprep.subr.bf16.mxu0 %v2279_v1  ;;  %v582_v7 = vpack.c.bf16 %v575_v4, %v574_v3  ;;  %v577_v8 = vld [vmem:[%s572_s27 + $0x18] sm:$0xff]  ;;  %v578_v9 = vld [vmem:[%s572_s27 + $0x20] sm:$0xff]  ;;  %v579_v10 = vld [vmem:[%s572_s27 + $0x28] sm:$0xff]  ;;  %s2427_s20 = scalar_lea.vmem %s3275_s22, 16  ;;  %s2433_s23 = scalar_lea.vmem %s2432_s25, 32 }
  0x25   : > { %v583_v11 = vpack.c.bf16 %v577_v8, %v576_v5  ;;  %v584_v12 = vpack.c.bf16 %v579_v10, %v578_v9  ;;  %v580_v13 = vld [vmem:[%s572_s27 + $0x30] sm:$0xff]  ;;  %v581_v14 = vld [vmem:[%s572_s27 + $0x38] sm:$0xff]  ;;  %s3273_s27 = scalar_lea.hbm %s3333_s18, %s2127_s29  ;;  %p2428_p11 = scmp.ne.s32.totalorder %s3275_s22, %s2427_s20 }
  0x26   : > { %2170 = vmatprep.mubr.msk.bf16.mxu0 %vm613_vm1, %v582_v7  ;;  %v585_v15 = vpack.c.bf16 %v581_v14, %v580_v13  ;;  %v3340_v14 = vmov 0.0   ;;  %p2434_p0 = scmp.lt.s32.totalorder %s3275_s22, %s2432_s25  ;;  %p2435_p1 = scmp.lt.s32.totalorder %s2433_s23, %s2427_s20 }
  0x27   : > { %2167 = vmatpush3.bf16.msra.mxu0 %v2279_v1  ;;  %909 = vst.msk [vmem:[#allocation2 + $0x20] sm:$0xff] %vm904_vm3, %v3340_v14  ;;  %905 = vst.msk [vmem:[#allocation2] sm:$0xff] %vm904_vm3, %v3340_v14  ;;  %2188 = vmatprep.subr.bf16.mxu1 %v3340_v14  ;;  %p2429_p12 = pnand %p2428_p11, %p2627_p5 }
  0x28   : > { %2236 = vmatprep.subr.msk.bf16.mxu0 %vm626_vm0, %v2280_v2  ;;  %906 = vst.msk [vmem:[#allocation2 + $0x8] sm:$0xff] %vm904_vm3, %v3340_v14  ;;  %907 = vst.msk [vmem:[#allocation2 + $0x10] sm:$0xff] %vm904_vm3, %v3340_v14  ;;  %p2436_p2 = por %p2435_p1, %p2434_p0 }
  0x29   : > { %908 = vst.msk [vmem:[#allocation2 + $0x18] sm:$0xff] %vm904_vm3, %v3340_v14  ;;  %910 = vst.msk [vmem:[#allocation2 + $0x28] sm:$0xff] %vm904_vm3, %v3340_v14  ;;  %p2430_p13 = pneg %p2429_p12 }
  0x2a   : > { %911 = vst.msk [vmem:[#allocation2 + $0x30] sm:$0xff] %vm904_vm3, %v3340_v14  ;;  %912 = vst.msk [vmem:[#allocation2 + $0x38] sm:$0xff] %vm904_vm3, %v3340_v14 }
  0x2b   : > { %2169 = vmatpush3.bf16.msra.mxu0 %v628_v6  ;;  %913 = vst.msk [vmem:[#allocation2 + $0x40] sm:$0xff] %vm904_vm3, %v3340_v14  ;;  %914 = vst.msk [vmem:[#allocation2 + $0x48] sm:$0xff] %vm904_vm3, %v3340_v14  ;;  %p2437_p3 = pnand %p2436_p2, %p2430_p13 }
  0x2c   : > { %915 = vst.msk [vmem:[#allocation2 + $0x50] sm:$0xff] %vm904_vm3, %v3340_v14  ;;  %916 = vst.msk [vmem:[#allocation2 + $0x58] sm:$0xff] %vm904_vm3, %v3340_v14  ;;  %2196 = vmatprep.subr.bf16.mxu0 %v3340_v14 }
  0x2e   : > { %2171 = vmatmul.mubr.msk.bf16.vlgmr.msra.gmra.mrb[0].mxu0 %vm613_vm1, %v583_v11 }
  0x2f   : > { %2174 = vmatprep.mubr.msk.bf16.mxu0 %vm613_vm1, %v584_v12 }
  0x36   : > { %2175 = vmatmul.mubr.msk.bf16.gmra.mrb[4].mxu0 %vm613_vm1, %v585_v15  ;;  %v2282_v15 = vld [vmem:[%s3323_s8] sm:$0xff]  }
  0x37   : > { %2198 = vmatprep.mubr.msk.bf16.mxu0 %vm2492_vm4, %v3340_v14 }
 0x101   : > { %v2172_v18 = vpop.f32.mrb[0].mxu0 }
 0x102   : > { %v673_v19 = vadd.f32 %v2172_v18, %v2030_v17  ;;  %v664_v20 = vpop.f32.mrb[1].mxu0 }
 0x103   : > { %v665_v21 = vadd.f32 %v2030_v17, %v664_v20  ;;  %v2173_v22 = vpop.f32.mrb[2].mxu0 }
 0x104   : > { %v2040_v23 = vmul.f32 -1.442695, %v673_v19  ;;  %v676_v24 = vadd.f32 %v2173_v22, %v2030_v17  ;;  %v667_v25 = vpop.f32.mrb[3].mxu0 }
 0x105   : > { %v2038_v26 = vmul.f32 -1.442695, %v665_v21  ;;  %v668_v27 = vadd.f32 %v2030_v17, %v667_v25 }
 0x106   : > { %2291 = vpow2.f32 %v2040_v23  ;;  %v2041_v28 = vmul.f32 -1.442695, %v676_v24 }
 0x107   : > { %2293 = vpow2.f32 %v2038_v26  ;;  %v2039_v29 = vmul.f32 -1.442695, %v668_v27 }
 0x108   : > { %2295 = vpow2.f32 %v2041_v28 }
 0x109   : > { %2297 = vpow2.f32 %v2039_v29  ;;  %v2176_v30 = vpop.f32.mrb[4].mxu0 }
 0x10a   : > { %v689_v31 = vadd.f32 %v2176_v30, %v2030_v17  ;;  %v680_v32 = vpop.f32.mrb[5].mxu0 }
 0x10b   : > { %v681_v33 = vadd.f32 %v2030_v17, %v680_v32  ;;  %v2177_v34 = vpop.f32.mrb[6].mxu0 }
 0x10c   : > { %v2044_v35 = vmul.f32 -1.442695, %v689_v31  ;;  %v692_v36 = vadd.f32 %v2177_v34, %v2030_v17  ;;  %v683_v37 = vpop.f32.mrb[7].mxu0 }
 0x10d   : > { %v2042_v38 = vmul.f32 -1.442695, %v681_v33  ;;  %v684_v39 = vadd.f32 %v2030_v17, %v683_v37  ;;  %v2046_v17 = vld [vmem:[%s3319_s4] ss:$0 sm:$0xff] }
 0x10e   : > { %2299 = vpow2.f32 %v2044_v35  ;;  %v2045_v40 = vmul.f32 -1.442695, %v692_v36 }
 0x10f   : > { %2301 = vpow2.f32 %v2042_v38  ;;  %v2043_v41 = vmul.f32 -1.442695, %v684_v39 }
 0x110   : > { %v2292_v42 = vpop.eup %2291  ;;  %2303 = vpow2.f32 %v2045_v40 }
 0x111   : > { %v2294_v43 = vpop.eup %2293  ;;  %v721_v44 = vadd.f32 1.0, %v2292_v42  ;;  %2305 = vpow2.f32 %v2043_v41 }
 0x112   : > { %v2296_v45 = vpop.eup %2295  ;;  %v719_v46 = vadd.f32 1.0, %v2294_v43 }
 0x113   : > { %v2298_v47 = vpop.eup %2297  ;;  %2307 = vrcp.f32 %v721_v44  ;;  %v722_v48 = vadd.f32 1.0, %v2296_v45 }
 0x114   : > { %2309 = vrcp.f32 %v719_v46  ;;  %v720_v49 = vadd.f32 1.0, %v2298_v47 }
 0x115   : > { %2311 = vrcp.f32 %v722_v48 }
 0x116   : > { %2313 = vrcp.f32 %v720_v49 }
 0x118   : > { %v2300_v50 = vpop.eup %2299 }
 0x119   : > { %v2302_v51 = vpop.eup %2301  ;;  %v725_v52 = vadd.f32 1.0, %v2300_v50 }
 0x11a   : > { %v2304_v53 = vpop.eup %2303  ;;  %v723_v54 = vadd.f32 1.0, %v2302_v51 }
 0x11b   : > { %v2306_v55 = vpop.eup %2305  ;;  %2315 = vrcp.f32 %v725_v52  ;;  %v726_v56 = vadd.f32 1.0, %v2304_v53 }
 0x11c   : > { %2317 = vrcp.f32 %v723_v54  ;;  %v724_v57 = vadd.f32 1.0, %v2306_v55 }
 0x11d   : > { %v2308_v58 = vpop.eup %2307  ;;  %2319 = vrcp.f32 %v726_v56 }
 0x11e   : > { %v2310_v59 = vpop.eup %2309  ;;  %2321 = vrcp.f32 %v724_v57  ;;  %v2669_v1 = vmul.f32 %v2308_v58, %v673_v19 }
 0x11f   : > { %v2312_v60 = vpop.eup %2311  ;;  %v2665_v63 = vmul.f32 %v2310_v59, %v665_v21  ;;  %v1078_v59 = vld [vmem:[#allocation2 + $0x7] sm:$0xff] }
 0x120   : > { %v2314_v61 = vpop.eup %2313  ;;  %v2663_v62 = vmul.f32 %v2312_v60, %v676_v24 }
 0x121   : > { %3361 = vst [vmem:[#allocation11_spill] sm:$0xff] %v2665_v63  ;;  %v2667_v0 = vmul.f32 %v2314_v61, %v668_v27 }
 0x122   : > { %v752_v3 = vpack.c.bf16 %v2663_v62, %v2669_v1 }
 0x123   : > { %3362 = vst [vmem:[#allocation12_spill] sm:$0xff] %v2667_v0  ;;  %v751_v2 = vpack.c.bf16 %v2667_v0, %v2665_v63 }
 0x125   : > { %v2316_v4 = vpop.eup %2315  ;;  %2180 = vmatprep.mubr.msk.bf16.mxu1 %vm770_vm2, %v751_v2 }
 0x126   : > { %v2318_v5 = vpop.eup %2317  ;;  %2181 = vmatmul.mubr.msk.bf16.vlgmr.msra.gmra.mrb[0].mxu1 %vm770_vm2, %v752_v3  ;;  %v2683_v11 = vmul.f32 %v2316_v4, %v689_v31 }
 0x127   : > { %v2320_v6 = vpop.eup %2319  ;;  %v2679_v9 = vmul.f32 %v2318_v5, %v681_v33  ;;  %2189 = vmatpush3.bf16.msra.mxu1 %v2282_v15  ;;  %v925_v33 = vlaneseq }
 0x128   : > { %v2322_v7 = vpop.eup %2321  ;;  %v2677_v8 = vmul.f32 %v2320_v6, %v692_v36  ;;  %3366 = vst [vmem:[#allocation16_spill] sm:$0xff] %v2683_v11  ;;  %2190 = vmatprep.subr.bf16.mxu1 %v3340_v14 }
 0x129   : > { %3364 = vst [vmem:[#allocation14_spill] sm:$0xff] %v2679_v9  ;;  %v2681_v10 = vmul.f32 %v2322_v7, %v684_v39  ;;  %v2752_v41 = vshrl.u32 %v925_v33, 7 }
 0x12a   : > { %3363 = vst [vmem:[#allocation13_spill] sm:$0xff] %v2677_v8  ;;  %v754_v13 = vpack.c.bf16 %v2677_v8, %v2683_v11 }
 0x12b   : > { %3365 = vst [vmem:[#allocation15_spill] sm:$0xff] %v2681_v10  ;;  %v753_v12 = vpack.c.bf16 %v2681_v10, %v2679_v9  ;;  %2191 = vmatpush3.bf16.msra.mxu1 %v2283_v16  ;;  %v938_v49 = vand.u32 7, %v2752_v41  ;;  %v927_v57 = vadd.s32 8, %v2752_v41  ;;  %v928_v61 = vadd.s32 16, %v2752_v41  ;;  %v2775_v16 = vld [vmem:[%s3320_s5] ss:$0 sm:$0xff] }
 0x12c   : > { %v929_v2 = vadd.s32 24, %v2752_v41  ;;  %v930_v4 = vadd.s32 32, %v2752_v41 }
 0x12d   : > { %2184 = vmatprep.mubr.msk.bf16.mxu1 %vm770_vm2, %v753_v12  ;;  %vm1030_vm5 = vcmp.ge.s32.totalorder %v938_v49, 1  ;;  %v945_v15 = vand.u32 7, %v927_v57  ;;  %vm1054_vm7 = vcmp.le.s32.totalorder %v938_v49, 6 }
 0x12e   : > { %2185 = vmatmul.mubr.msk.bf16.gmra.mrb[4].mxu1 %vm770_vm2, %v754_v13  ;;  %v2760_v58 = vsel %vm1030_vm5, 1.0, %v3340_v14  ;;  %v2770_v13 = vld [vmem:[%s3320_s5 + $0x1] ss:$0 sm:$0xff] }
 0x12f   : > { %2192 = vmatprep.mubr.msk.bf16.mxu1 %vm2492_vm4, %v3340_v14  ;;  %v1086_v6 = vmul.f32 %v2760_v58, %v1078_v59  ;;  %vm1031_vm6 = vcmp.ge.s32.totalorder %v945_v15, 1  ;;  %vm2793_vm11 = vcmp.le.s32.totalorder %v945_v15, 6 }
 0x1f9   : > { %v2182_v18 = vpop.f32.mrb[0].mxu1 }
 0x1fa   : > { %v2731_v19 = vadd.f32 %v2182_v18, %v2046_v17  ;;  %v817_v20 = vpop.f32.mrb[1].mxu1 }
 0x1fb   : > { %v2733_v21 = vadd.f32 %v2046_v17, %v817_v20  ;;  %v2183_v22 = vpop.f32.mrb[2].mxu1 }
 0x1fc   : > { %v2054_v23 = vmul.f32 -1.442695, %v2731_v19  ;;  %v2736_v24 = vadd.f32 %v2183_v22, %v2046_v17  ;;  %v820_v25 = vpop.f32.mrb[3].mxu1  ;;  %v952_v22 = vand.u32 7, %v928_v61 }
 0x1fd   : > { %v2052_v26 = vmul.f32 -1.442695, %v2733_v21  ;;  %v2739_v27 = vadd.f32 %v2046_v17, %v820_v25  ;;  %v931_v25 = vadd.s32 40, %v2752_v41 }
 0x1fe   : > { %2323 = vpow2.f32 %v2054_v23  ;;  %v2055_v28 = vmul.f32 -1.442695, %v2736_v24  ;;  %v959_v23 = vand.u32 7, %v929_v2  ;;  %vm1032_vm8 = vcmp.ge.s32.totalorder %v952_v22, 1 }
 0x1ff   : > { %2325 = vpow2.f32 %v2052_v26  ;;  %v2053_v29 = vmul.f32 -1.442695, %v2739_v27  ;;  %vm2803_vm12 = vcmp.le.s32.totalorder %v952_v22, 6  ;;  %v2889_v22 = vld [vmem:[%s3320_s5 + $0x7] ss:$0 sm:$0xff] }
 0x200   : > { %2327 = vpow2.f32 %v2055_v28  ;;  %v966_v28 = vand.u32 7, %v930_v4  ;;  %vm1033_vm9 = vcmp.ge.s32.totalorder %v959_v23, 1  ;;  %vm2813_vm13 = vcmp.le.s32.totalorder %v959_v23, 6 }
 0x201   : > { %2329 = vpow2.f32 %v2053_v29  ;;  %v2186_v30 = vpop.f32.mrb[4].mxu1  ;;  %v932_v29 = vadd.s32 48, %v2752_v41  ;;  %v2811_v49 = vsel %vm1033_vm9, 1.0, %v3340_v14  ;;  %vm1525_vm9 = vcmask 64512  }
 0x202   : > { %v2743_v31 = vadd.f32 %v2186_v30, %v2046_v17  ;;  %v833_v32 = vpop.f32.mrb[5].mxu1  ;;  %v933_v30 = vadd.s32 56, %v2752_v41  ;;  %vm2789_vm10 = vcmp.ge.s32.totalorder %v966_v28, 1  ;;  %vm2839_vm15 = vcmp.le.s32.totalorder %v966_v28, 6 }
 0x203   : > { %v2745_v34 = vadd.f32 %v2046_v17, %v833_v32  ;;  %v2187_v35 = vpop.f32.mrb[6].mxu1  ;;  %v1099_v32 = vmul.f32 %v2775_v16, %v1086_v6  ;;  %v2905_v28 = vsel %vm2839_vm15, 1.0, %v3340_v14 }
 0x204   : > { %v2058_v36 = vmul.f32 -1.442695, %v2743_v31  ;;  %v2748_v37 = vadd.f32 %v2187_v35, %v2046_v17  ;;  %v836_v38 = vpop.f32.mrb[7].mxu1 }
 0x205   : > { %v2056_v39 = vmul.f32 -1.442695, %v2745_v34  ;;  %v2754_v47 = vadd.f32 %v2046_v17, %v836_v38  ;;  %v1115_v17 = vld [vmem:[#allocation2 + $0x8] sm:$0xff] }
 0x206   : > { %2331 = vpow2.f32 %v2058_v36  ;;  %v2059_v40 = vmul.f32 -1.442695, %v2748_v37 }
 0x207   : > { %2333 = vpow2.f32 %v2056_v39  ;;  %v2057_v52 = vmul.f32 -1.442695, %v2754_v47  ;;  %v980_v39 = vand.u32 7, %v932_v29  ;;  %v1293_v29 = vld [vmem:[#allocation2 + $0x50] sm:$0xff] }
 0x208   : > { %v2324_v42 = vpop.eup %2323  ;;  %2335 = vpow2.f32 %v2059_v40 }
 0x209   : > { %v2326_v43 = vpop.eup %2325  ;;  %v874_v44 = vadd.f32 1.0, %v2324_v42  ;;  %v2798_v42 = vsel %vm1031_vm6, 1.0, %v3340_v14  ;;  %vm2844_vm1 = vcmp.ge.s32.totalorder %v980_v39, 1 }
 0x20a   : > { %v2328_v45 = vpop.eup %2327  ;;  %v872_v46 = vadd.f32 1.0, %v2326_v43  ;;  %v2801_v43 = vsel %vm1054_vm7, 1.0, %v3340_v14  ;;  %vm2876_vm7 = vcmp.le.s32.totalorder %v980_v39, 6 }
 0x20b   : > { %v2330_v48 = vpop.eup %2329  ;;  %2337 = vrcp.f32 %v874_v44  ;;  %v875_v50 = vadd.f32 1.0, %v2328_v45  ;;  %v2931_v45 = vsel %vm2876_vm7, 1.0, %v3340_v14 }
 0x20c   : > { %2339 = vrcp.f32 %v872_v46  ;;  %v873_v51 = vadd.f32 1.0, %v2330_v48  ;;  %v2808_v48 = vsel %vm1032_vm8, 1.0, %v3340_v14 }
 0x20d   : > { %2341 = vrcp.f32 %v875_v50 }
 0x20e   : > { %2343 = vrcp.f32 %v873_v51 }
 0x20f   : > { %2345 = vpow2.f32 %v2057_v52 }
 0x210   : > { %v2332_v53 = vpop.eup %2331 }
 0x211   : > { %v2334_v54 = vpop.eup %2333  ;;  %v878_v55 = vadd.f32 1.0, %v2332_v53  ;;  %v2821_v53 = vld [vmem:[%s3320_s5 + $0x2] ss:$0 sm:$0xff] }
 0x212   : > { %v2336_v56 = vpop.eup %2335  ;;  %v876_v60 = vadd.f32 1.0, %v2334_v54  ;;  %v2826_v54 = vsel %vm2789_vm10, 1.0, %v3340_v14 }
 0x213   : > { %2347 = vrcp.f32 %v878_v55  ;;  %v879_v3 = vadd.f32 1.0, %v2336_v56  ;;  %v2831_v55 = vsel %vm2793_vm11, 1.0, %v3340_v14 }
 0x214   : > { %2349 = vrcp.f32 %v876_v60 }
 0x215   : > { %v2338_v5 = vpop.eup %2337  ;;  %2351 = vrcp.f32 %v879_v3 }
 0x216   : > { %v2340_v7 = vpop.eup %2339  ;;  %v898_v12 = vmul.f32 %v2338_v5, %v2731_v19 }
 0x217   : > { %v2342_v18 = vpop.eup %2341  ;;  %v896_v20 = vmul.f32 %v2340_v7, %v2733_v21  ;;  %v1128_v21 = vmul.f32 %v2770_v13, %v1115_v17  ;;  %v2868_v7 = vld [vmem:[%s3320_s5 + $0x3] ss:$0 sm:$0xff] }
 0x218   : > { %v2344_v19 = vpop.eup %2343  ;;  %919 = vst.msk [vmem:[#allocation2 + $0x20] sm:$0xff] %vm904_vm3, %v898_v12  ;;  %v899_v26 = vmul.f32 %v2342_v18, %v2736_v24  ;;  %v973_v24 = vand.u32 7, %v931_v25  ;;  %v2873_v12 = vsel %vm2803_vm12, 1.0, %v3340_v14 }
 0x219   : > { %917 = vst.msk [vmem:[#allocation2 + $0x10] sm:$0xff] %vm904_vm3, %v896_v20  ;;  %v897_v33 = vmul.f32 %v2344_v19, %v2739_v27  ;;  %v2346_v35 = vpop.eup %2345  ;;  %v987_v27 = vand.u32 7, %v933_v30  ;;  %v1136_v44 = vadd.f32 %v1128_v21, %v1099_v32  ;;  %v2895_v19 = vsel %vm2813_vm13, 1.0, %v3340_v14 }
 0x21a   : > { %920 = vst.msk [vmem:[#allocation2 + $0x28] sm:$0xff] %vm904_vm3, %v899_v26  ;;  %vm2834_vm14 = vcmp.ge.s32.totalorder %v973_v24, 1  ;;  %vm2856_vm6 = vcmp.le.s32.totalorder %v973_v24, 6  ;;  %v877_v17 = vadd.f32 1.0, %v2346_v35 }
 0x21b   : > { %918 = vst.msk [vmem:[#allocation2 + $0x18] sm:$0xff] %vm904_vm3, %v897_v33  ;;  %vm2848_vm5 = vcmp.ge.s32.totalorder %v987_v27, 1  ;;  %vm2880_vm8 = vcmp.le.s32.totalorder %v987_v27, 6  ;;  %v2900_v26 = vsel %vm2834_vm14, 1.0, %v3340_v14  ;;  %v2911_v33 = vsel %vm2844_vm1, 1.0, %v3340_v14 }
 0x21c   : > { %v2916_v24 = vsel %vm2848_vm5, 1.0, %v3340_v14  ;;  %v2921_v35 = vsel %vm2856_vm6, 1.0, %v3340_v14  ;;  %2353 = vrcp.f32 %v877_v17 }
 0x21d   : > { %v2348_v40 = vpop.eup %2347 }
 0x21e   : > { %v2350_v46 = vpop.eup %2349  ;;  %v902_v51 = vmul.f32 %v2348_v40, %v2743_v31 }
 0x21f   : > { %v2352_v52 = vpop.eup %2351  ;;  %v900_v56 = vmul.f32 %v2350_v46, %v2745_v34  ;;  %v2884_v20 = vld [vmem:[#allocation2 + $0x20] sm:$0xff]  ;;  %v2936_v46 = vsel %vm2880_vm8, 1.0, %v3340_v14 }
 0x220   : > { %v1079_v57 = vld [vmem:[#allocation2 + $0xf] sm:$0xff]  ;;  %923 = vst.msk [vmem:[#allocation2 + $0x40] sm:$0xff] %vm904_vm3, %v902_v51  ;;  %v903_v61 = vmul.f32 %v2352_v52, %v2748_v37  ;;  %v2863_v37 = vld [vmem:[%s3320_s5 + $0x4] ss:$0 sm:$0xff]  ;;  %v2944_v52 = vmul.f32 %v2889_v22, %v1293_v29 }
 0x221   : > { %v1144_v59 = vld [vmem:[#allocation2 + $0x9] sm:$0xff]  ;;  %v1087_v3 = vmul.f32 %v2798_v42, %v1079_v57  ;;  %v1182_v5 = vmul.f32 %v2760_v58, %v1079_v57  ;;  %921 = vst.msk [vmem:[#allocation2 + $0x30] sm:$0xff] %vm904_vm3, %v900_v56  ;;  %v2924_v39 = vld [vmem:[#allocation2 + $0x21] sm:$0xff] }
 0x222   : > { %v1152_v4 = vmul.f32 %v2801_v43, %v1144_v59  ;;  %924 = vst.msk [vmem:[#allocation2 + $0x48] sm:$0xff] %vm904_vm3, %v903_v61  ;;  %v1116_v23 = vld [vmem:[#allocation2 + $0x10] sm:$0xff]  ;;  %v1081_v21 = vld [vmem:[#allocation2 + $0x1f] sm:$0xff]  ;;  %v1082_v57 = vld [vmem:[#allocation2 + $0x27] sm:$0xff]  ;;  %v1155_v2 = vmul.f32 %v2895_v19, %v2924_v39 }
 0x223   : > { %v1100_v30 = vmul.f32 %v2775_v16, %v1087_v3  ;;  %v1080_v32 = vld [vmem:[#allocation2 + $0x17] sm:$0xff]  ;;  %v1195_v38 = vmul.f32 %v2868_v7, %v1182_v5  ;;  %v1129_v50 = vmul.f32 %v2770_v13, %v1116_v23  ;;  %v1217_v31 = vmul.f32 %v2863_v37, %v1116_v23  ;;  %v2963_v23 = vld [vmem:[%s3320_s5 + $0x5] ss:$0 sm:$0xff] }
 0x224   : > { %v1165_v25 = vmul.f32 %v2821_v53, %v1152_v4  ;;  %v1145_v27 = vld [vmem:[#allocation2 + $0x11] sm:$0xff]  ;;  %v2926_v40 = vld [vmem:[#allocation2 + $0x19] sm:$0xff]  ;;  %v1088_v59 = vmul.f32 %v2808_v48, %v1080_v32  ;;  %v1089_v60 = vmul.f32 %v2811_v49, %v1081_v21  ;;  %v1183_v15 = vmul.f32 %v2798_v42, %v1080_v32 }
 0x225   : > { %v2941_v51 = vld [vmem:[#allocation2 + $0x18] sm:$0xff]  ;;  %v1137_v61 = vadd.f32 %v1129_v50, %v1100_v30  ;;  %v1153_v34 = vmul.f32 %v2831_v55, %v1145_v27  ;;  %v1154_v3 = vmul.f32 %v2873_v12, %v2926_v40  ;;  %v1090_v18 = vmul.f32 %v2826_v54, %v1082_v57 }
 0x226   : > { %v1173_v36 = vadd.f32 %v1165_v25, %v1136_v44  ;;  %v1131_v44 = vmul.f32 %v2770_v13, %v2884_v20  ;;  %v1101_v4 = vmul.f32 %v2775_v16, %v1088_v59  ;;  %v1102_v5 = vmul.f32 %v2775_v16, %v1089_v60  ;;  %v1315_v59 = vld [vmem:[#allocation2 + $0x51] sm:$0xff] }
 0x227   : > { %v1130_v6 = vmul.f32 %v2770_v13, %v2941_v51  ;;  %v1166_v25 = vmul.f32 %v2821_v53, %v1153_v34  ;;  %v1184_v29 = vmul.f32 %v2808_v48, %v1081_v21  ;;  %v1234_v50 = vmul.f32 %v2801_v43, %v1145_v27 }
 0x228   : > { %v1203_v56 = vadd.f32 %v1195_v38, %v1173_v36  ;;  %v1139_v36 = vadd.f32 %v1131_v44, %v1102_v5  ;;  %v1167_v38 = vmul.f32 %v2821_v53, %v1154_v3  ;;  %v1264_v14 = vmul.f32 %v2760_v58, %v1080_v32  ;;  %v2978_v44 = vld [vmem:[%s3320_s5 + $0x6] ss:$0 sm:$0xff] }
 0x229   : > { %v1138_v30 = vadd.f32 %v1130_v6, %v1101_v4  ;;  %v1174_v60 = vadd.f32 %v1166_v25, %v1137_v61  ;;  %v1168_v10 = vmul.f32 %v2821_v53, %v1155_v2  ;;  %v1185_v34 = vmul.f32 %v2811_v49, %v1082_v57  ;;  %v1119_v2 = vld [vmem:[#allocation2 + $0x28] sm:$0xff] }
 0x22a   : > { %v1225_v17 = vadd.f32 %v1217_v31, %v1203_v56  ;;  %v1196_v56 = vmul.f32 %v2868_v7, %v1183_v15  ;;  %v1235_v31 = vmul.f32 %v2831_v55, %v2926_v40  ;;  %v1247_v27 = vmul.f32 %v2963_v23, %v1234_v50 }
 0x22b   : > { %v1175_v3 = vadd.f32 %v1167_v38, %v1138_v30  ;;  %v1197_v61 = vmul.f32 %v2868_v7, %v1184_v29  ;;  %v1218_v5 = vmul.f32 %v2863_v37, %v2941_v51  ;;  %v2985_v58 = vmul.f32 %v2936_v46, %v1315_v59  ;;  %v1148_v30 = vld [vmem:[#allocation2 + $0x29] sm:$0xff]  ;;  %v2354_v38 = vpop.eup %2353 }
 0x22c   : > { %v1204_v4 = vadd.f32 %v1196_v56, %v1174_v60  ;;  %v1219_v32 = vmul.f32 %v2863_v37, %v2884_v20  ;;  %v1176_v6 = vadd.f32 %v1168_v10, %v1139_v36  ;;  %v1255_v15 = vadd.f32 %v1247_v27, %v1225_v17 }
 0x22d   : > { %v1265_v25 = vmul.f32 %v2798_v42, %v1081_v21  ;;  %v1205_v50 = vadd.f32 %v1197_v61, %v1175_v3  ;;  %v1248_v29 = vmul.f32 %v2963_v23, %v1235_v31  ;;  %v1277_v60 = vmul.f32 %v2978_v44, %v1264_v14 }
 0x22e   : > { %v1226_v9 = vadd.f32 %v1218_v5, %v1204_v4  ;;  %v1300_v59 = vmul.f32 %v2889_v22, %v2884_v20  ;;  %v1103_v56 = vmul.f32 %v2775_v16, %v1090_v18  ;;  %v1198_v8 = vmul.f32 %v2868_v7, %v1185_v34  ;;  %v3007_v18 = vld [vmem:[%s3320_s5 + $0x8] ss:$0 sm:$0xff]  ;;  %v1083_v4 = vld [vmem:[#allocation2 + $0x2f] sm:$0xff] }
 0x22f   : > { %v1236_v10 = vmul.f32 %v2873_v12, %v2924_v39  ;;  %v1132_v42 = vmul.f32 %v2770_v13, %v1119_v2  ;;  %v1285_v17 = vadd.f32 %v1277_v60, %v1255_v15  ;;  %v1156_v36 = vmul.f32 %v2905_v28, %v1148_v30  ;;  %v1120_v60 = vld [vmem:[#allocation2 + $0x30] sm:$0xff] }
 0x230   : > { %v1256_v21 = vadd.f32 %v1248_v29, %v1226_v9  ;;  %v1220_v31 = vmul.f32 %v2863_v37, %v1119_v2  ;;  %v1266_v14 = vmul.f32 %v2808_v48, %v1082_v57  ;;  %v1317_v20 = vmul.f32 %v2831_v55, %v2924_v39 }
 0x231   : > { %v1206_v3 = vadd.f32 %v1198_v8, %v1176_v6  ;;  %v1227_v34 = vadd.f32 %v1219_v32, %v1205_v50  ;;  %v1278_v27 = vmul.f32 %v2978_v44, %v1265_v25  ;;  %v1299_v9 = vmul.f32 %v2889_v22, %v2941_v51  ;;  %v1122_v6 = vld [vmem:[#allocation2 + $0x40] sm:$0xff] }
 0x232   : > { %v1316_v61 = vmul.f32 %v2801_v43, %v2926_v40  ;;  %v1140_v48 = vadd.f32 %v1132_v42, %v1103_v56  ;;  %v1249_v57 = vmul.f32 %v2963_v23, %v1236_v10  ;;  %v1169_v8 = vmul.f32 %v2821_v53, %v1156_v36  ;;  %v1181_v36 = vld [vmem:[#allocation2 + $0x47] sm:$0xff] }
 0x233   : > { %v1237_v55 = vmul.f32 %v2895_v19, %v1148_v30  ;;  %v1301_v39 = vmul.f32 %v2889_v22, %v1119_v2  ;;  %v1286_v5 = vadd.f32 %v1278_v27, %v1256_v21  ;;  %v1307_v32 = vadd.f32 %v1299_v9, %v1285_v17 }
 0x234   : > { %v1228_v15 = vadd.f32 %v1220_v31, %v1206_v3  ;;  %v1279_v25 = vmul.f32 %v2978_v44, %v1266_v14  ;;  %v1330_v51 = vmul.f32 %v3007_v18, %v1317_v20  ;;  %v1091_v43 = vmul.f32 %v2900_v26, %v1083_v4  ;;  %v1151_v3 = vld [vmem:[#allocation2 + $0x41] sm:$0xff] }
 0x235   : > { %v1186_v40 = vmul.f32 %v2826_v54, %v1083_v4  ;;  %v1257_v50 = vadd.f32 %v1249_v57, %v1227_v34  ;;  %v1329_v29 = vmul.f32 %v3007_v18, %v1316_v61  ;;  %v1250_v56 = vmul.f32 %v2963_v23, %v1237_v55 }
 0x236   : > { %v1267_v2 = vmul.f32 %v2811_v49, %v1083_v4  ;;  %v3026_v10 = vmul.f32 %v2770_v13, %v1122_v6  ;;  %v3029_v42 = vmul.f32 %v2863_v37, %v1122_v6  ;;  %v1177_v21 = vadd.f32 %v1169_v8, %v1140_v48  ;;  %v3049_v8 = vld [vmem:[#allocation2 + $0x48] sm:$0xff] }
 0x237   : > { %v1318_v17 = vmul.f32 %v2873_v12, %v1148_v30  ;;  %v1308_v31 = vadd.f32 %v1300_v59, %v1286_v5  ;;  %v1337_v14 = vadd.f32 %v1329_v29, %v1307_v32  ;;  %v1258_v20 = vadd.f32 %v1250_v56, %v1228_v15  ;;  %v3042_v12 = vld [vmem:[%s3321_s6] ss:$0 sm:$0xff]  ;;  %v1263_v15 = vld [vmem:[#allocation2 + $0x4f] sm:$0xff] }
 0x238   : > { %v901_v34 = vmul.f32 %v2354_v38, %v2754_v47  ;;  %v3034_v27 = vmul.f32 %v2889_v22, %v1122_v6  ;;  %v1104_v49 = vmul.f32 %v2775_v16, %v1091_v43  ;;  %v1133_v9 = vmul.f32 %v2770_v13, %v1120_v60  ;;  %v1233_v38 = vld [vmem:[#allocation2 + $0x49] sm:$0xff]  ;;  %v3056_v32 = vld [vmem:[%s3322_s7] ss:$0 sm:$0xff] }
 0x239   : > { %v1199_v61 = vmul.f32 %v2868_v7, %v1186_v40  ;;  %v1221_v30 = vmul.f32 %v2863_v37, %v1120_v60  ;;  %v1280_v59 = vmul.f32 %v2978_v44, %v1267_v2  ;;  %v1189_v47 = vmul.f32 %v2916_v24, %v1181_v36 }
 0x23a   : > { %922 = vst.msk [vmem:[#allocation2 + $0x38] sm:$0xff] %vm904_vm3, %v901_v34  ;;  %v1287_v4 = vadd.f32 %v1279_v25, %v1257_v50  ;;  %v1331_v57 = vmul.f32 %v3007_v18, %v1318_v17  ;;  %v1240_v55 = vmul.f32 %v2931_v45, %v1151_v3  ;;  %v1270_v5 = vmul.f32 %v2911_v33, %v1181_v36 }
 0x23b   : > { %v1207_v48 = vadd.f32 %v1199_v61, %v1177_v21  ;;  %v1288_v6 = vadd.f32 %v1280_v59, %v1258_v20  ;;  %v1338_v40 = vadd.f32 %v1330_v51, %v1308_v31  ;;  %v1352_v25 = vmul.f32 %v3042_v12, %v1337_v14 }
 0x23c   : > { %v1309_v43 = vadd.f32 %v1301_v39, %v1287_v4  ;;  %v1141_v50 = vadd.f32 %v1133_v9, %v1104_v49  ;;  %v1302_v29 = vmul.f32 %v2889_v22, %v1120_v60  ;;  %v1159_v56 = vmul.f32 %v2936_v46, %v1151_v3 }
 0x23d   : > { %v1241_v2 = vmul.f32 %v2936_v46, %v1233_v38  ;;  %v3064_v21 = vmul.f32 %v2863_v37, %v3049_v8  ;;  %v1353_v36 = vmul.f32 %v3042_v12, %v1338_v40  ;;  %v3068_v20 = vadd.f32 %v3056_v32, %v1352_v25 }
 0x23e   : > { %v1339_v17 = vadd.f32 %v1331_v57, %v1309_v43  ;;  %v1229_v39 = vadd.f32 %v1221_v30, %v1207_v48  ;;  %v1202_v51 = vmul.f32 %v2868_v7, %v1189_v47  ;;  %v3072_v31 = vmul.f32 %v2963_v23, %v1240_v55 }
 0x23f   : > { %v3075_v60 = vmul.f32 %v2916_v24, %v1263_v15  ;;  %v1310_v46 = vadd.f32 %v1302_v29, %v1288_v6  ;;  %v3078_v14 = vmul.f32 %v2921_v35, %v1151_v3  ;;  %v3081_v34 = vmul.f32 %v2978_v44, %v1270_v5 }
 0x240   : > { %v3084_v49 = vmul.f32 %v2931_v45, %v1233_v38  ;;  %v1172_v59 = vmul.f32 %v2821_v53, %v1159_v56  ;;  %v1254_v47 = vmul.f32 %v2963_v23, %v1241_v2  ;;  %v1354_v4 = vmul.f32 %v3042_v12, %v1339_v17 }
 0x241   : > { %v1084_v9 = vld [vmem:[#allocation2 + $0x37] sm:$0xff]  ;;  %v1085_v61 = vld [vmem:[#allocation2 + $0x3f] sm:$0xff]  ;;  %v3090_v48 = vadd.f32 %v3056_v32, %v1353_v36  ;;  %v2087_v6 = vmul.f32 -1.442695, %v3068_v20 }
 0x242   : > { %v1121_v30 = vld [vmem:[#allocation2 + $0x38] sm:$0xff]  ;;  %v1092_v3 = vmul.f32 %v2911_v33, %v1084_v9  ;;  %v1093_v57 = vmul.f32 %v2916_v24, %v1085_v61  ;;  %v1187_v38 = vmul.f32 %v2900_v26, %v1084_v9  ;;  %v1188_v25 = vmul.f32 %v2911_v33, %v1085_v61 }
 0x243   : > { %v1149_v55 = vld [vmem:[#allocation2 + $0x31] sm:$0xff]  ;;  %v1150_v5 = vld [vmem:[#allocation2 + $0x39] sm:$0xff]  ;;  %v1134_v15 = vmul.f32 %v2770_v13, %v1121_v30  ;;  %v1222_v24 = vmul.f32 %v2863_v37, %v1121_v30  ;;  %2355 = vpow2.f32 %v2087_v6 }
 0x244   : > { %v1157_v43 = vmul.f32 %v2921_v35, %v1149_v55  ;;  %v1158_v40 = vmul.f32 %v2931_v45, %v1150_v5  ;;  %v1105_v29 = vmul.f32 %v2775_v16, %v1092_v3  ;;  %v1106_v56 = vmul.f32 %v2775_v16, %v1093_v57 }
 0x245   : > { %v1238_v2 = vmul.f32 %v2905_v28, %v1149_v55  ;;  %v1200_v13 = vmul.f32 %v2868_v7, %v1187_v38  ;;  %v1239_v11 = vmul.f32 %v2921_v35, %v1150_v5  ;;  %v1268_v3 = vmul.f32 %v2826_v54, %v1084_v9 }
 0x246   : > { %v1170_v17 = vmul.f32 %v2821_v53, %v1157_v43  ;;  %v1171_v36 = vmul.f32 %v2821_v53, %v1158_v40  ;;  %v1142_v0 = vadd.f32 %v1134_v15, %v1105_v29  ;;  %v1143_v45 = vadd.f32 %v3026_v10, %v1106_v56 }
 0x247   : > { %v1251_v33 = vmul.f32 %v2963_v23, %v1238_v2  ;;  %v1201_v37 = vmul.f32 %v2868_v7, %v1188_v25  ;;  %v1252_v57 = vmul.f32 %v2963_v23, %v1239_v11  ;;  %v1269_v43 = vmul.f32 %v2900_v26, %v1085_v61 }
 0x248   : > { %v1178_v16 = vadd.f32 %v1170_v17, %v1141_v50  ;;  %v1179_v63 = vadd.f32 %v1171_v36, %v1142_v0  ;;  %v1281_v38 = vmul.f32 %v2978_v44, %v1268_v3  ;;  %v1319_v35 = vmul.f32 %v2895_v19, %v1149_v55 }
 0x249   : > { %v1259_v53 = vadd.f32 %v1251_v33, %v1229_v39  ;;  %v1303_v10 = vmul.f32 %v2889_v22, %v1121_v30  ;;  %v1320_v40 = vmul.f32 %v2905_v28, %v1150_v5  ;;  %v1180_v29 = vadd.f32 %v1172_v59, %v1143_v45 }
 0x24a   : > { %v1208_v15 = vadd.f32 %v1200_v13, %v1178_v16  ;;  %v1209_v54 = vadd.f32 %v1201_v37, %v1179_v63  ;;  %v1332_v50 = vmul.f32 %v3007_v18, %v1319_v35  ;;  %v3120_v11 = vadd.f32 %v3056_v32, %v1354_v4 }
 0x24b   : > { %v1289_v7 = vadd.f32 %v1281_v38, %v1259_v53  ;;  %v1210_v0 = vadd.f32 %v1202_v51, %v1180_v29  ;;  %v1333_v23 = vmul.f32 %v3007_v18, %v1320_v40  ;;  %v2088_v61 = vmul.f32 -1.442695, %v3090_v48 }
 0x24c   : > { %v1230_v26 = vadd.f32 %v1222_v24, %v1208_v15  ;;  %v1231_v19 = vadd.f32 %v3029_v42, %v1209_v54  ;;  %v1340_v9 = vadd.f32 %v1332_v50, %v1310_v46  ;;  %v1282_v28 = vmul.f32 %v2978_v44, %v1269_v43 }
 0x24d   : > { %v1311_v39 = vadd.f32 %v1303_v10, %v1289_v7  ;;  %v1232_v63 = vadd.f32 %v3064_v21, %v1210_v0  ;;  %v2089_v59 = vmul.f32 -1.442695, %v3120_v11  ;;  %2357 = vpow2.f32 %v2088_v61 }
 0x24e   : > { %v1260_v30 = vadd.f32 %v1252_v57, %v1230_v26  ;;  %v1261_v4 = vadd.f32 %v3072_v31, %v1231_v19  ;;  %v1355_v51 = vmul.f32 %v3042_v12, %v1340_v9  ;;  %v1284_v42 = vmul.f32 %v2978_v44, %v3075_v60 }
 0x24f   : > { %v1341_v55 = vadd.f32 %v1333_v23, %v1311_v39  ;;  %v1262_v5 = vadd.f32 %v1254_v47, %v1232_v63  ;;  %2359 = vpow2.f32 %v2089_v59  ;;  %v1305_v21 = vmul.f32 %v2889_v22, %v3049_v8 }
 0x250   : > { %v1290_v46 = vadd.f32 %v1282_v28, %v1260_v30  ;;  %v1291_v6 = vadd.f32 %v3081_v34, %v1261_v4  ;;  %v1370_v56 = vadd.f32 %v3056_v32, %v1355_v51  ;;  %v1334_v47 = vmul.f32 %v3007_v18, %v3078_v14 }
 0x251   : > { %v1356_v25 = vmul.f32 %v3042_v12, %v1341_v55  ;;  %v1292_v31 = vadd.f32 %v1284_v42, %v1262_v5  ;;  %v1336_v44 = vmul.f32 %v3007_v18, %v2985_v58  ;;  %v1335_v34 = vmul.f32 %v3007_v18, %v3084_v49 }
 0x252   : > { %v1312_v24 = vadd.f32 %v3034_v27, %v1290_v46  ;;  %v1313_v60 = vadd.f32 %v1305_v21, %v1291_v6  ;;  %v2090_v22 = vmul.f32 -1.442695, %v1370_v56  ;;  %v2356_v27 = vpop.eup %2355 }
 0x253   : > { %v1371_v2 = vadd.f32 %v3056_v32, %v1356_v25  ;;  %v1314_v8 = vadd.f32 %v2944_v52, %v1292_v31  ;;  %v1399_v58 = vadd.f32 1.0, %v2356_v27 }
 0x254   : > { %v1342_v17 = vadd.f32 %v1334_v47, %v1312_v24  ;;  %v1343_v36 = vadd.f32 %v1335_v34, %v1313_v60  ;;  %2361 = vpow2.f32 %v2090_v22 }
 0x255   : > { %v2091_v13 = vmul.f32 -1.442695, %v1371_v2  ;;  %v1344_v45 = vadd.f32 %v1336_v44, %v1314_v8 }
 0x256   : > { %v1357_v14 = vmul.f32 %v3042_v12, %v1342_v17  ;;  %v1358_v33 = vmul.f32 %v3042_v12, %v1343_v36 }
 0x257   : > { %2363 = vpow2.f32 %v2091_v13  ;;  %v1359_v3 = vmul.f32 %v3042_v12, %v1344_v45  ;;  %v2358_v49 = vpop.eup %2357 }
 0x258   : > { %v1372_v18 = vadd.f32 %v3056_v32, %v1357_v14  ;;  %v1373_v16 = vadd.f32 %v3056_v32, %v1358_v33  ;;  %v1400_v53 = vadd.f32 1.0, %v2358_v49  ;;  %2365 = vrcp.f32 %v1399_v58  ;;  %v1523_v58 = vld [vmem:[%s3325_s10] sm:$0xf] }
 0x259   : > { %v2360_v52 = vpop.eup %2359  ;;  %v1374_v37 = vadd.f32 %v3056_v32, %v1359_v3  ;;  %v1530_v3 = vsel %vm626_vm0, %v1523_v58, 0  ;;  %vm1854_vm0 = vcmask 523264  }
 0x25a   : > { %v2092_v57 = vmul.f32 -1.442695, %v1372_v18  ;;  %v2093_v43 = vmul.f32 -1.442695, %v1373_v16  ;;  %v1401_v35 = vadd.f32 1.0, %v2360_v52  ;;  %2197 = vmatpush3.bf16.msra.mxu0 %v1530_v3 }
 0x25b   : > { %v2094_v38 = vmul.f32 -1.442695, %v1374_v37 }
 0x25c   : > { %2367 = vpow2.f32 %v2092_v57 }
 0x25d   : > { %2369 = vpow2.f32 %v2093_v43 }
 0x25e   : > { %2371 = vpow2.f32 %v2094_v38  ;;  %v2362_v15 = vpop.eup %2361 }
 0x25f   : > { %2373 = vrcp.f32 %v1400_v53  ;;  %v1402_v12 = vadd.f32 1.0, %v2362_v15 }
 0x260   : > { %2375 = vrcp.f32 %v1401_v35 }
 0x261   : > { %v2364_v10 = vpop.eup %2363  ;;  %2377 = vrcp.f32 %v1402_v12 }
 0x262   : > { %v1403_v40 = vadd.f32 1.0, %v2364_v10  ;;  %v2366_v29 = vpop.eup %2365  ;;  %v2284_v10 = vld [vmem:[%s3327_s12] sm:$0xff]  }
 0x263   : > { %v3153_v0 = vmul.f32 %v2366_v29, %v3068_v20  ;;  %2202 = vmatprep.subr.bf16.mxu1 %v2284_v10  ;;  %v3389_v29 = vmov 0.0  }
 0x264   : > { %2379 = vrcp.f32 %v1403_v40  ;;  %v2285_v40 = vld [vmem:[%s3327_s12 + $0x8] sm:$0xff]  }
 0x265   : > { %v1431_v63 = vsel %vm904_vm3, %v3153_v0, 0.0 }
 0x266   : > { %v2368_v54 = vpop.eup %2367 }
 0x267   : > { %v2370_v32 = vpop.eup %2369  ;;  %v1404_v50 = vadd.f32 1.0, %v2368_v54  ;;  %v1524_v54 = vld [vmem:[%s3326_s11] sm:$0x1] }
 0x268   : > { %v2372_v7 = vpop.eup %2371  ;;  %v1405_v26 = vadd.f32 1.0, %v2370_v32 }
 0x269   : > { %v2374_v23 = vpop.eup %2373  ;;  %v1406_v19 = vadd.f32 1.0, %v2372_v7  ;;  %2381 = vrcp.f32 %v1404_v50 }
 0x26a   : > { %v2376_v39 = vpop.eup %2375  ;;  %2383 = vrcp.f32 %v1405_v26  ;;  %v3156_v9 = vmul.f32 %v2374_v23, %v3090_v48 }
 0x26b   : > { %2385 = vrcp.f32 %v1406_v19  ;;  %v3159_v61 = vmul.f32 %v2376_v39, %v3120_v11  ;;  %v2378_v28 = vpop.eup %2377 }
 0x26c   : > { %v1432_v20 = vsel %vm904_vm3, %v3156_v9, 0.0  ;;  %v3165_v30 = vmul.f32 %v2378_v28, %v1370_v56 }
 0x26d   : > { %v1433_v59 = vadd.f32 %v1432_v20, %v1431_v63  ;;  %v1434_v4 = vsel %vm904_vm3, %v3159_v61, 0.0  ;;  %v1580_v63 = vsub.s32 0, %v2752_v41 }
 0x26e   : > { %v2380_v55 = vpop.eup %2379  ;;  %v1436_v11 = vsel %vm904_vm3, %v3165_v30, 0.0 }
 0x26f   : > { %v3169_v48 = vmul.f32 %v2380_v55, %v1371_v2  ;;  %v1435_v51 = vadd.f32 %v1434_v4, %v1433_v59 }
 0x271   : > { %v1437_v5 = vadd.f32 %v1436_v11, %v1435_v51  ;;  %v1438_v42 = vsel %vm904_vm3, %v3169_v48, 0.0 }
 0x273   : > { %v2382_v46 = vpop.eup %2381  ;;  %v1439_v6 = vadd.f32 %v1438_v42, %v1437_v5 }
 0x274   : > { %v2384_v21 = vpop.eup %2383  ;;  %v3175_v25 = vmul.f32 %v2382_v46, %v1372_v18  ;;  %v1459_v18 = vld [vmem:[%s3324_s9] sm:$0x1] }
 0x275   : > { %v2386_v56 = vpop.eup %2385  ;;  %v3177_v31 = vmul.f32 %v2384_v21, %v1373_v16 }
 0x276   : > { %v3179_v24 = vmul.f32 %v2386_v56, %v1374_v37  ;;  %v1440_v47 = vsel %vm904_vm3, %v3175_v25, 0.0 }
 0x277   : > { %v1441_v44 = vadd.f32 %v1440_v47, %v1439_v6  ;;  %v1442_v60 = vsel %vm904_vm3, %v3177_v31, 0.0 }
 0x278   : > { %v1444_v2 = vsel %vm904_vm3, %v3179_v24, 0.0 }
 0x279   : > { %v1443_v34 = vadd.f32 %v1442_v60, %v1441_v44 }
 0x27b   : > { %v1445_v22 = vadd.f32 %v1444_v2, %v1443_v34 }
 0x27d   : > { %v1446_v8 = vrot.slane %v1445_v22, 4 }
 0x27f   : > { %v1447_v17 = vadd.f32 %v1446_v8, %v1445_v22  ;;  %v3390_v22 = vld [vmem:[#allocation11_spill] sm:$0xff] }
 0x281   : > { %v1448_v36 = vrot.slane %v1447_v17, 2 }
 0x283   : > { %v1449_v13 = vadd.f32 %v1448_v36, %v1447_v17  ;;  %v3391_v17 = vld [vmem:[#allocation12_spill] sm:$0xff] }
 0x285   : > { %v1450_v27 = vrot.slane %v1449_v13, 1 }
 0x287   : > { %v1451_v45 = vadd.f32 %v1450_v27, %v1449_v13 }
 0x289   : > { %v1453_v14 = vmul.f32 0.015625, %v1451_v45 }
 0x28b   : > { %v1454_v33 = vpack.c.bf16 %v1453_v14, %v1453_v14 }
 0x28d   : > { %2193 = vmatmul.mubr.msk.bf16.vlgmr.msra.gmra.mrb[8].mxu1 %vm904_vm3, %v1454_v33 }
 0x28e   : > { %2203 = vmatpush3.bf16.msra.mxu1 %v2284_v10  ;;  %v2288_v10 = vld [vmem:[%s3331_s16 + $0x8] sm:$0xff]  }
 0x28f   : > { %2204 = vmatprep.subr.bf16.mxu1 %v2285_v40 }
 0x292   : > { %2205 = vmatpush3.bf16.msra.mxu1 %v2285_v40  ;;  %v2289_v40 = vld [vmem:[%s3331_s16 + $0x10] sm:$0xff]  }
 0x293   : > { %2224 = vmatprep.subr.bf16.mxu1 %v3389_v29 }
 0x360   : > { %v1509_v49 = vpop.f32.mrb[8].mxu1 }
 0x361   : > { %v1510_v16 = vadd.f32 %v1509_v49, %v1459_v18  ;;  %v2194_v52 = vpop.f32.mrb[9].mxu1 }
 0x362   : > { %v1512_v37 = vpop.f32.mrb[10].mxu1  ;;  %v3393_v52 = vld [vmem:[#allocation13_spill] sm:$0xff] }
 0x363   : > { %v2098_v57 = vmul.f32 -1.442695, %v1510_v16  ;;  %v2195_v43 = vpop.f32.mrb[11].mxu1 }
 0x365   : > { %2387 = vpow2.f32 %v2098_v57  ;;  %v3394_v57 = vld [vmem:[#allocation14_spill] sm:$0xff] }
 0x36f   : > { %v2388_v53 = vpop.eup %2387 }
 0x370   : > { %v1518_v38 = vadd.f32 1.0, %v2388_v53  ;;  %v3395_v53 = vld [vmem:[#allocation15_spill] sm:$0xff] }
 0x372   : > { %2389 = vrcp.f32 %v1518_v38 }
 0x37c   : > { %v2390_v35 = vpop.eup %2389 }
 0x37d   : > { %v1521_v15 = vmul.f32 %v2390_v35, %v1510_v16  ;;  %v3392_v16 = vld [vmem:[#allocation16_spill] sm:$0xff] }
 0x37f   : > { %v1522_v12 = vpack.c.bf16 %v1521_v15, %v1521_v15 }
 0x381   : > { %2199 = vmatmul.mubr.msk.bf16.vlgmr.msra.gmra.mrb[8].mxu0 %vm1525_vm9, %v1522_v12  ;;  %v2287_v12 = vld [vmem:[%s3331_s16] sm:$0xff]  }
 0x454   : > { %v1566_v32 = vpop.f32.mrb[8].mxu0 }
 0x455   : > { %v1567_v50 = vadd.f32 %v1566_v32, %v1524_v54  ;;  %v2200_v7 = vpop.f32.mrb[9].mxu0  ;;  %v2290_v54 = vld [vmem:[%s3331_s16 + $0x18] sm:$0xff]   ;;  %v2108_v32 = vld [vmem:[%s3330_s15] ss:$0 sm:$0xff] }
 0x456   : > { %v1569_v26 = vpop.f32.mrb[10].mxu0 }
 0x457   : > { %v2100_v23 = vmul.f32 -1.442695, %v1567_v50  ;;  %v2201_v19 = vpop.f32.mrb[11].mxu0 }
 0x459   : > { %2391 = vpow2.f32 %v2100_v23 }
 0x463   : > { %v2392_v39 = vpop.eup %2391 }
 0x464   : > { %v1575_v28 = vadd.f32 1.0, %v2392_v39 }
 0x466   : > { %2393 = vrcp.f32 %v1575_v28 }
 0x470   : > { %v2394_v20 = vpop.eup %2393 }
 0x471   : > { %v1581_v59 = vrot.slane %v2394_v20, %v1580_v63 }
 0x473   : > { %v1582_v4 = vmul.f32 %v1581_v59, %v3153_v0  ;;  %v1583_v55 = vmul.f32 %v1581_v59, %v3156_v9  ;;  %v1584_v51 = vmul.f32 %v1581_v59, %v3159_v61  ;;  %v1585_v11 = vmul.f32 %v1581_v59, %v3165_v30  ;;  %v2286_v61 = vld [vmem:[%s3329_s14] sm:$0xff]  }
 0x474   : > { %v1586_v5 = vmul.f32 %v1581_v59, %v3169_v48  ;;  %v1587_v42 = vmul.f32 %v1581_v59, %v3175_v25  ;;  %v1588_v41 = vmul.f32 %v1581_v59, %v3177_v31  ;;  %v1589_v0 = vmul.f32 %v1581_v59, %v3179_v24  ;;  %2214 = vmatprep.subr.bf16.mxu0 %v2286_v61  ;;  %v2101_v30 = vld [vmem:[%s3328_s13] ss:$0 sm:$0xff] }
 0x475   : > { %v1590_v46 = vpack.c.bf16 %v1583_v55, %v1582_v4  ;;  %v1591_v6 = vpack.c.bf16 %v1585_v11, %v1584_v51  ;;  %2215 = vmatpush3.bf16.msra.mxu0 %v2286_v61 }
 0x476   : > { %v1592_v21 = vpack.c.bf16 %v1587_v42, %v1586_v5  ;;  %v1593_v9 = vpack.c.bf16 %v1589_v0, %v1588_v41 }
 0x477   : > { %2206 = vmatprep.mubr.msk.bf16.mxu1 %vm904_vm3, %v1590_v46 }
 0x478   : > { %2207 = vmatmul.mubr.msk.bf16.vlgmr.msra.gmra.mrb[12].mxu1 %vm904_vm3, %v1591_v6 }
 0x479   : > { %2210 = vmatprep.mubr.msk.bf16.mxu1 %vm904_vm3, %v1592_v21  ;;  %2225 = vmatpush3.bf16.msra.mxu1 %v2287_v12 }
 0x47a   : > { %2226 = vmatprep.subr.bf16.mxu1 %v3389_v29 }
 0x47d   : > { %2227 = vmatpush3.bf16.msra.mxu1 %v2288_v10 }
 0x47e   : > { %2228 = vmatprep.subr.bf16.mxu1 %v3389_v29 }
 0x480   : > { %2211 = vmatmul.mubr.msk.bf16.gmra.mrb[16].mxu1 %vm904_vm3, %v1593_v9 }
 0x481   : > { %2232 = vmatprep.mubr.msk.bf16.mxu1 %vm2492_vm4, %v3389_v29  ;;  %2229 = vmatpush3.bf16.msra.mxu1 %v2289_v40 }
 0x482   : > { %2230 = vmatprep.subr.bf16.mxu1 %v3389_v29 }
 0x485   : > { %2231 = vmatpush3.bf16.msra.mxu1 %v2290_v54 }
 0x54b   : > { %v2208_v48 = vpop.f32.mrb[12].mxu1 }
 0x54c   : > { %v1672_v25 = vadd.f32 %v2208_v48, %v2101_v30  ;;  %v1663_v56 = vpop.f32.mrb[13].mxu1 }
 0x54d   : > { %v1664_v31 = vadd.f32 %v2101_v30, %v1663_v56  ;;  %v2209_v24 = vpop.f32.mrb[14].mxu1 }
 0x54e   : > { %v1675_v47 = vadd.f32 %v2209_v24, %v2101_v30  ;;  %v1666_v44 = vpop.f32.mrb[15].mxu1  ;;  %v1696_v34 = vadd.f32 %v1672_v25, %v2669_v1 }
 0x54f   : > { %v1667_v60 = vadd.f32 %v2101_v30, %v1666_v44  ;;  %v1694_v8 = vadd.f32 %v1664_v31, %v3390_v22 }
 0x550   : > { %v1697_v2 = vadd.f32 %v1675_v47, %v2663_v62 }
 0x551   : > { %v1695_v36 = vadd.f32 %v1667_v60, %v3391_v17 }
 0x552   : > { %v1703_v13 = vpack.c.bf16 %v1697_v2, %v1696_v34 }
 0x553   : > { %v1702_v27 = vpack.c.bf16 %v1695_v36, %v1694_v8  ;;  %v2212_v45 = vpop.f32.mrb[16].mxu1 }
 0x554   : > { %v1688_v14 = vadd.f32 %v2212_v45, %v2101_v30  ;;  %v1679_v33 = vpop.f32.mrb[17].mxu1 }
 0x555   : > { %v1680_v58 = vadd.f32 %v2101_v30, %v1679_v33  ;;  %v2213_v3 = vpop.f32.mrb[18].mxu1  ;;  %2216 = vmatprep.mubr.msk.bf16.mxu0 %vm770_vm2, %v1702_v27 }
 0x556   : > { %v1691_v18 = vadd.f32 %v2213_v3, %v2101_v30  ;;  %v1682_v49 = vpop.f32.mrb[19].mxu1  ;;  %2217 = vmatmul.mubr.msk.bf16.vlgmr.msra.gmra.mrb[12].mxu0 %vm770_vm2, %v1703_v13  ;;  %v1700_v62 = vadd.f32 %v1688_v14, %v3392_v16 }
 0x557   : > { %v1683_v1 = vadd.f32 %v2101_v30, %v1682_v49  ;;  %v1698_v43 = vadd.f32 %v1680_v58, %v3394_v57 }
 0x558   : > { %v1701_v37 = vadd.f32 %v1691_v18, %v3393_v52 }
 0x559   : > { %v1699_v38 = vadd.f32 %v1683_v1, %v3395_v53 }
 0x55a   : > { %v1705_v35 = vpack.c.bf16 %v1701_v37, %v1700_v62 }
 0x55b   : > { %v1704_v15 = vpack.c.bf16 %v1699_v38, %v1698_v43 }
 0x55d   : > { %2220 = vmatprep.mubr.msk.bf16.mxu0 %vm770_vm2, %v1704_v15 }
 0x55e   : > { %2221 = vmatmul.mubr.msk.bf16.gmra.mrb[16].mxu0 %vm770_vm2, %v1705_v35  ;;  %vm1954_vm2 = vcmask 155648  }
 0x629   : > { %v2218_v50 = vpop.f32.mrb[12].mxu0 }
 0x62a   : > { %v1776_v7 = vadd.f32 %v2218_v50, %v2108_v32  ;;  %v1767_v26 = vpop.f32.mrb[13].mxu0 }
 0x62b   : > { %v1768_v23 = vadd.f32 %v2108_v32, %v1767_v26  ;;  %v2219_v19 = vpop.f32.mrb[14].mxu0 }
 0x62c   : > { %v2116_v39 = vmul.f32 -1.442695, %v1776_v7  ;;  %v1779_v28 = vadd.f32 %v2219_v19, %v2108_v32  ;;  %v1770_v63 = vpop.f32.mrb[15].mxu0 }
 0x62d   : > { %v2114_v20 = vmul.f32 -1.442695, %v1768_v23  ;;  %v1771_v59 = vadd.f32 %v2108_v32, %v1770_v63 }
 0x62e   : > { %2395 = vpow2.f32 %v2116_v39  ;;  %v2117_v4 = vmul.f32 -1.442695, %v1779_v28 }
 0x62f   : > { %2397 = vpow2.f32 %v2114_v20  ;;  %v2115_v55 = vmul.f32 -1.442695, %v1771_v59 }
 0x630   : > { %2399 = vpow2.f32 %v2117_v4 }
 0x631   : > { %2401 = vpow2.f32 %v2115_v55  ;;  %v2222_v29 = vpop.f32.mrb[16].mxu0 }
 0x632   : > { %v1792_v51 = vadd.f32 %v2222_v29, %v2108_v32  ;;  %v1783_v11 = vpop.f32.mrb[17].mxu0 }
 0x633   : > { %v1784_v5 = vadd.f32 %v2108_v32, %v1783_v11  ;;  %v2223_v42 = vpop.f32.mrb[18].mxu0 }
 0x634   : > { %v2120_v46 = vmul.f32 -1.442695, %v1792_v51  ;;  %v1795_v6 = vadd.f32 %v2223_v42, %v2108_v32  ;;  %v1786_v21 = vpop.f32.mrb[19].mxu0 }
 0x635   : > { %v2118_v41 = vmul.f32 -1.442695, %v1784_v5  ;;  %v1787_v0 = vadd.f32 %v2108_v32, %v1786_v21 }
 0x636   : > { %2403 = vpow2.f32 %v2120_v46  ;;  %v2121_v9 = vmul.f32 -1.442695, %v1795_v6 }
 0x637   : > { %2405 = vpow2.f32 %v2118_v41  ;;  %v2119_v61 = vmul.f32 -1.442695, %v1787_v0 }
 0x638   : > { %v2396_v30 = vpop.eup %2395  ;;  %2407 = vpow2.f32 %v2121_v9 }
 0x639   : > { %v2398_v48 = vpop.eup %2397  ;;  %v1824_v25 = vadd.f32 1.0, %v2396_v30  ;;  %2409 = vpow2.f32 %v2119_v61 }
 0x63a   : > { %v2400_v56 = vpop.eup %2399  ;;  %v1822_v31 = vadd.f32 1.0, %v2398_v48 }
 0x63b   : > { %v2402_v24 = vpop.eup %2401  ;;  %2411 = vrcp.f32 %v1824_v25  ;;  %v1825_v47 = vadd.f32 1.0, %v2400_v56 }
 0x63c   : > { %2413 = vrcp.f32 %v1822_v31  ;;  %v1823_v44 = vadd.f32 1.0, %v2402_v24 }
 0x63d   : > { %2415 = vrcp.f32 %v1825_v47 }
 0x63e   : > { %2417 = vrcp.f32 %v1823_v44 }
 0x640   : > { %v2404_v60 = vpop.eup %2403 }
 0x641   : > { %v2406_v34 = vpop.eup %2405  ;;  %v1828_v2 = vadd.f32 1.0, %v2404_v60 }
 0x642   : > { %v2408_v22 = vpop.eup %2407  ;;  %v1826_v8 = vadd.f32 1.0, %v2406_v34 }
 0x643   : > { %v2410_v17 = vpop.eup %2409  ;;  %2419 = vrcp.f32 %v1828_v2  ;;  %v1829_v36 = vadd.f32 1.0, %v2408_v22 }
 0x644   : > { %2421 = vrcp.f32 %v1826_v8  ;;  %v1827_v13 = vadd.f32 1.0, %v2410_v17 }
 0x645   : > { %v2412_v27 = vpop.eup %2411  ;;  %2423 = vrcp.f32 %v1829_v36 }
 0x646   : > { %v2414_v45 = vpop.eup %2413  ;;  %2425 = vrcp.f32 %v1827_v13  ;;  %v1848_v3 = vmul.f32 %v2412_v27, %v1776_v7 }
 0x647   : > { %v2416_v14 = vpop.eup %2415  ;;  %v1846_v33 = vmul.f32 %v2414_v45, %v1768_v23 }
 0x648   : > { %v2418_v58 = vpop.eup %2417  ;;  %v1849_v1 = vmul.f32 %v2416_v14, %v1779_v28  ;;  %v1858_v37 = vsel %vm1854_vm0, %v1848_v3, 0.0 }
 0x649   : > { %v1847_v18 = vmul.f32 %v2418_v58, %v1771_v59  ;;  %v1855_v49 = vsel %vm1854_vm0, %v1846_v33, 0.0 }
 0x64a   : > { %v1860_v38 = vsel %vm1854_vm0, %v1849_v1, 0.0 }
 0x64b   : > { %v1856_v16 = vsel %vm1854_vm0, %v1847_v18, 0.0 }
 0x64c   : > { %v1857_v62 = vadd.f32 %v1856_v16, %v1855_v49 }
 0x64d   : > { %v2420_v52 = vpop.eup %2419 }
 0x64e   : > { %v2422_v57 = vpop.eup %2421  ;;  %v1859_v43 = vadd.f32 %v1858_v37, %v1857_v62  ;;  %v1852_v10 = vmul.f32 %v2420_v52, %v1792_v51 }
 0x64f   : > { %v2424_v53 = vpop.eup %2423  ;;  %v1850_v35 = vmul.f32 %v2422_v57, %v1784_v5  ;;  %v1886_v5 = vld [vmem:[%s3332_s17] sm:$0x1] }
 0x650   : > { %v2426_v15 = vpop.eup %2425  ;;  %v1861_v12 = vadd.f32 %v1860_v38, %v1859_v43  ;;  %v1853_v50 = vmul.f32 %v2424_v53, %v1795_v6  ;;  %v1866_v23 = vsel %vm1854_vm0, %v1852_v10, 0.0 }
 0x651   : > { %v1862_v40 = vsel %vm1854_vm0, %v1850_v35, 0.0  ;;  %v1851_v54 = vmul.f32 %v2426_v15, %v1787_v0 }
 0x652   : > { %v1863_v32 = vadd.f32 %v1862_v40, %v1861_v12  ;;  %v1868_v39 = vsel %vm1854_vm0, %v1853_v50, 0.0 }
 0x653   : > { %v1864_v7 = vsel %vm1854_vm0, %v1851_v54, 0.0 }
 0x654   : > { %v1865_v26 = vadd.f32 %v1864_v7, %v1863_v32 }
 0x656   : > { %v1867_v19 = vadd.f32 %v1866_v23, %v1865_v26 }
 0x658   : > { %v1869_v28 = vadd.f32 %v1868_v39, %v1867_v19 }
 0x65a   : > { %v1870_v63 = vrot.slane %v1869_v28, 4 }
 0x65c   : > { %v1871_v20 = vadd.f32 %v1870_v63, %v1869_v28 }
 0x65e   : > { %v1872_v59 = vrot.slane %v1871_v20, 2 }
 0x660   : > { %v1873_v4 = vadd.f32 %v1872_v59, %v1871_v20 }
 0x662   : > { %v1874_v55 = vrot.slane %v1873_v4, 1 }
 0x664   : > { %v1875_v29 = vadd.f32 %v1874_v55, %v1873_v4 }
 0x666   : > { %v1876_v51 = vmul.f32 0.015625, %v1875_v29 }
 0x668   : > { %v1877_v11 = vpack.c.bf16 %v1876_v51, %v1876_v51 }
 0x66a   : > { %2233 = vmatmul.mubr.msk.bf16.vlgmr.msra.gmra.mrb[20].mxu1 %vm1854_vm0, %v1877_v11 }
 0x73d   : > { %v1948_v42 = vpop.f32.mrb[20].mxu1 }
 0x73e   : > { %v1949_v46 = vadd.f32 %v1948_v42, %v1886_v5  ;;  %v2234_v6 = vpop.f32.mrb[21].mxu1 }
 0x73f   : > { %v1951_v21 = vpop.f32.mrb[22].mxu1 }
 0x740   : > { %v2235_v41 = vpop.f32.mrb[23].mxu1  ;;  %1955 = vst.msk [vmem:[%s567_s1] sm:$0x1] %vm1954_vm2, %v1949_v46 }
 0x741   : > { %2440 = shalt.err (!%p2437_p3)
}
 0x742   : > { %s2441_s21 = scalar_lea.hbm %s3273_s27, 16  ;;  %s2445_s19 = scalar_lea.hbm %s3333_s18, 32 }
 0x743   : > { %p2442_p4 = scmp.ne.s32.totalorder %s3273_s27, %s2441_s21  ;;  %p2446_p9 = scmp.lt.u32.totalorder %s3273_s27, %s3333_s18 }
 0x744   : > { %p2447_p10 = scmp.lt.u32.totalorder %s2445_s19, %s2441_s21  ;;  %p2449_p12 = scmp.lt.u32.totalorder %s2441_s21, %s3273_s27 }
 0x745   : > { %p2443_p7 = pnand %p2442_p4, %p2627_p5 }
 0x746   : > { %p2448_p11 = por %p2447_p10, %p2446_p9 }
 0x747   : > { %p2444_p8 = pneg %p2443_p7 }
 0x748   : > { %p2450_p13 = por %p2449_p12, %p2448_p11 }
 0x74a   : > { %p2451_p0 = pnand %p2450_p13, %p2444_p8 }
 0x74c   : > { %2454 = shalt.err (!%p2451_p0)
}
 0x74d   : > { %2237 = dma.vmem_to_hbm [thread:$0]  (%p2627_p5), %s3275_s22, 16, %s3273_s27, %s1957_s0  }
 0x74e PF: > { %s3396_s20 = sld [smem:[#allocation6_spill]]  ;;  %p2243_p1 = scmp.ge.s32.totalorder %s2489_s30, 2 }
 0x750   : > { %p2240_p2 = pnand %p2243_p1, %p2631_p6 }
 0x754   : > { %s1981_s29 = sand.u32 1, %s3396_s20  }
 0x755   : > { %s1982_s1 = scalar_lea.sflag [#allocation4], %s1981_s29 }
 0x756   : > { %2472 = dma.done.wait (!%p2240_p2), %s1982_s1, 16  }
 0x757   : > { %2474 = vsyncadd (!%p2240_p2), %s1982_s1, 4294967280  ;;  %s3398_s30 = sld [smem:[#allocation8_spill]]  ;;  %s3399_s21 = sld [smem:[#allocation7_spill]] }
 0x758   : > { %s3400_s29 = sld [smem:[#allocation9_spill]]  ;;  %s3401_s27 = smov %s2481_s28 }
 0x75d   : > { %p28_p3 = scmp.ge.s32.totalorder %s3398_s30, 4   ;;  %s3402_s28 = smov %s3399_s21 }
 0x75f   :  { %30 = sbr.rel (!%p28_p3) target bundleno = 7 (0x7), region = 127 }
 0x766   :  { %1986 = vsyncpa [#allocation4], 1 }
 0x767   :  { %1988 = vsyncpa [#allocation4 + $0x1], 1 }

</bundles_post_ra>
